<compile_context>
chip_gen: v7x
topology: tpu7x:2x2x1
jax: 0.10.0
libtpu: 0.0.40
codegen_flags: <defaults>
</compile_context>

<pallas_src>
import jax
import jax.numpy as jnp
from jax.experimental import pallas as pl
from jax.experimental.pallas import tpu as pltpu

EPS = 1e-5


def _identity(n, dtype):
    # Small in-register identity built from 2-D iotas (1-D iota is not allowed).
    rows = jax.lax.broadcasted_iota(jnp.int32, (n, n), 0)
    cols = jax.lax.broadcasted_iota(jnp.int32, (n, n), 1)
    return (rows == cols).astype(dtype)


def bn_relu_conv_kernel(gb_ref, x_ref, w_ref, o_ref, acc_ref):
    # gb_ref:  (1, 2, tk)  f32   packed [gamma; beta] for this Cin slab
    # x_ref:   (tk, S)     bf16  activations (channels-major, spatial flattened)
    # w_ref:   (tk, Cout)  bf16  1x1 conv weight slab, (Cin, Cout) layout
    # o_ref:   (Cout, S)   f32   output (written on the last grid step only)
    # acc_ref: (S, Cout)   f32   VMEM accumulator, resident across grid steps
    k = pl.program_id(0)
    nk = pl.num_programs(0)

    @pl.when(k == 0)
    def _():
        acc_ref[...] = jnp.zeros_like(acc_ref)

    xk = x_ref[...]                                   # (tk, S) bf16
    tk_blk, s_len = xk.shape

    # DMA-free transpose on the MXU: ident(S,S) contracted against xk's S axis
    # (transpose_rhs matmul) -> (S, tk) f32.  Exact for bf16 inputs and avoids
    # relying on an XLU relayout of a non-(8,128)-aligned (tk, 49) tile.
    ident_s = _identity(s_len, xk.dtype)              # (S, S) bf16
    xt = jax.lax.dot_general(
        ident_s, xk,
        dimension_numbers=(((1,), (1,)), ((), ())),
        preferred_element_type=jnp.float32)           # (S, tk) f32

    # Training-mode BN stats, one fused sweep over the S axis (sublane reduce):
    # lane-dense (1, tk) mean / E[x^2] -> biased var = E[x^2] - mean^2.
    inv_s = 1.0 / s_len
    s1 = jnp.sum(xt, axis=0, keepdims=True)           # (1, tk)
    s2 = jnp.sum(xt * xt, axis=0, keepdims=True)      # (1, tk)
    mean = s1 * inv_s
    var = s2 * inv_s - mean * mean                    # biased variance

    gb = gb_ref[0]                                    # (2, tk) f32
    gamma = gb[0:1, :]                                # (1, tk)
    beta = gb[1:2, :]                                 # (1, tk)

    # Fold BN into a single per-channel affine; rsqrt runs on dense vregs.
    scale = gamma * jax.lax.rsqrt(var + EPS)          # (1, tk)
    shift = beta - mean * scale                       # (1, tk)

    # Affine + ReLU, then the 1x1 conv slab on the MXU with Cout on the lane
    # axis: (S, tk) @ (tk, Cout) -> (S, Cout), f32 accumulation.
    xr = jnp.maximum(xt * scale + shift, 0.0).astype(w_ref.dtype)
    acc_ref[...] += jnp.dot(xr, w_ref[...],
                            preferred_element_type=jnp.float32)

    @pl.when(k == nk - 1)
    def _():
        # Tiny transpose of the (S, Cout) accumulator back to (Cout, S) (again
        # via a transpose_rhs matmul) so the NCHW output is a free reshape.
        acc = acc_ref[...]                            # (S, Cout) f32
        ident_o = _identity(acc.shape[1], jnp.float32)
        o_ref[...] = jax.lax.dot_general(
            acc_ref.dtype.type(1.0) * ident_o, acc,
            dimension_numbers=(((1,), (1,)), ((), ())),
            preferred_element_type=jnp.float32)       # (Cout, S)


def _pick_num_k_steps(cin, requested):
    # 2-4 steps is the sweet spot (per-step overhead ~0.35 us); tk must be a
    # multiple of 8 and divide Cin evenly.
    for nk in (requested, 4, 3, 2):
        if nk >= 1 and cin % nk == 0 and (cin // nk) % 8 == 0:
            return nk
    return 1


def bn_relu_conv1x1(x_nchw, gamma, beta, w_ic, *, num_k_steps=3):
    """x_nchw: (N, Cin, H, W); gamma/beta: (Cin,);
    w_ic: (Cin, Cout) conv weight, pre-transposed (bf16 ok) -> (N, Cout, H, W) f32."""
    N, Cin, H, W = x_nchw.shape
    Cout = w_ic.shape[1]
    S = N * H * W

    nk = _pick_num_k_steps(Cin, num_k_steps)
    tk = Cin // nk

    # NCHW -> (Cin, S): for N == 1 this is a pure reshape (no data movement).
    if N == 1:
        x2d = x_nchw.reshape(Cin, S)
    else:
        x2d = jnp.transpose(x_nchw, (1, 0, 2, 3)).reshape(Cin, S)
    # Feed activations in bf16 (halves x's HBM traffic); stats are done in f32.
    x2d = x2d.astype(jnp.bfloat16)

    w_bf = w_ic.astype(jnp.bfloat16)                  # (Cin, Cout)

    # Pack gamma/beta into one lane-dense (nk, 2, tk) f32 array.
    gb = jnp.stack([gamma, beta]).astype(jnp.float32)          # (2, Cin)
    gb3 = gb.reshape(2, nk, tk).transpose(1, 0, 2)             # (nk, 2, tk)

    cost = pl.CostEstimate(
        flops=2 * S * Cin * Cout + 2 * S * S * Cin + 2 * Cout * Cout * S,
        transcendentals=Cin,
        bytes_accessed=(x2d.size * 2 + w_bf.size * 2 + gb3.size * 4
                        + Cout * S * 4),
    )

    out2d = pl.pallas_call(
        bn_relu_conv_kernel,
        out_shape=jax.ShapeDtypeStruct((Cout, S), jnp.float32),
        grid_spec=pltpu.PrefetchScalarGridSpec(
            num_scalar_prefetch=0,
            grid=(nk,),
            in_specs=[
                pl.BlockSpec((1, 2, tk), lambda k: (k, 0, 0)),   # gamma/beta
                pl.BlockSpec((tk, S), lambda k: (k, 0)),         # x slab
                pl.BlockSpec((tk, Cout), lambda k: (k, 0)),      # weight slab
            ],
            out_specs=pl.BlockSpec((Cout, S), lambda k: (0, 0)),
            scratch_shapes=[pltpu.VMEM((S, Cout), jnp.float32)],
        ),
        compiler_params=pltpu.CompilerParams(
            dimension_semantics=("arbitrary",)),
        cost_estimate=cost,
    )(gb3, x2d, w_bf)

    # (Cout, S) -> NCHW.  For N == 1 this is again a pure reshape.
    if N == 1:
        return out2d.reshape(1, Cout, H, W)
    return jnp.transpose(out2d.reshape(Cout, N, H, W), (1, 0, 2, 3))


def reference(x_nchw, gamma, beta, w_oi):
    x = x_nchw.astype(jnp.float32)
    mean = jnp.mean(x, axis=(0, 2, 3), keepdims=True)
    var = jnp.mean((x - mean) ** 2, axis=(0, 2, 3), keepdims=True)  # biased
    xn = (x - mean) * jax.lax.rsqrt(var + EPS)
    xn = xn * gamma.reshape(1, -1, 1, 1) + beta.reshape(1, -1, 1, 1)
    xr = jnp.maximum(xn, 0.0)
    return jnp.einsum("nchw,oc->nohw", xr, w_oi.astype(jnp.float32))


if __name__ == "__main__":
    N, Cin, H, W = 1, 1680, 7, 7
    Cout = 192

    key = jax.random.PRNGKey(0)
    kx, kg, kb, kw = jax.random.split(key, 4)

    x = jax.random.normal(kx, (N, Cin, H, W), dtype=jnp.float32)
    gamma = 1.0 + 0.1 * jax.random.normal(kg, (Cin,), dtype=jnp.float32)
    beta = 0.1 * jax.random.normal(kb, (Cin,), dtype=jnp.float32)
    w = jax.random.normal(kw, (Cout, Cin), dtype=jnp.float32) * (1.0 / jnp.sqrt(Cin))

    # One-time parameter prep ("offline"): conv weight transposed to (Cin, Cout)
    # and cast to bf16 so no transpose/cast sits on the hot path.
    w_ic_bf16 = jnp.asarray(w.T, dtype=jnp.bfloat16)

    out = bn_relu_conv1x1(x, gamma, beta, w_ic_bf16)
    out = jax.block_until_ready(out)

    ref = reference(x, gamma, beta, w)
    assert out.shape == (N, Cout, H, W), out.shape
    # bf16 activations + bf16 weights on the MXU (f32 accumulation) -> compare
    # at bf16-level tolerance.
    max_err = float(jnp.max(jnp.abs(out - ref)))
    assert jnp.allclose(out, ref, atol=2e-2, rtol=2e-2), max_err

    print("KERNEL_OK")
</pallas_src>

<mosaic_0001>
module attributes {stable_mosaic.version = 11 : i64} {
  func.func @bn_relu_conv_kernel(%arg0: i32, %arg1: memref<1x2x560xf32, #tpu.memory_space<vmem>>, %arg2: memref<560x49xbf16, #tpu.memory_space<vmem>>, %arg3: memref<560x192xbf16, #tpu.memory_space<vmem>>, %arg4: memref<192x49xf32, #tpu.memory_space<vmem>>, %arg5: memref<49x192xf32, #tpu.memory_space<vmem>>) attributes {dimension_semantics = [#tpu.dimension_semantics<arbitrary>], iteration_bounds = array<i64: 3>, scalar_prefetch = 0 : i64, scratch_operands = 1 : i64, tpu.core_type = #tpu.core_type<tc>, window_params = [{transform_indices = @transform_0, window_bounds = array<i64: 1, 2, 560>}, {transform_indices = @transform_1, window_bounds = array<i64: 560, 49>}, {transform_indices = @transform_2, window_bounds = array<i64: 560, 192>}, {pipeline_mode = #tpu.pipeline_mode<synchronous>, transform_indices = @transform_3, window_bounds = array<i64: 192, 49>}]} {
    %c0_i32 = arith.constant 0 : i32
    %0 = arith.cmpi eq, %arg0, %c0_i32 : i32
    %1 = arith.extui %0 : i1 to i32
    %c0_i32_0 = arith.constant 0 : i32
    %2 = arith.cmpi ne, %1, %c0_i32_0 : i32
    scf.if %2 {
      %cst_19 = arith.constant 0.000000e+00 : f32
      %47 = vector.broadcast %cst_19 : f32 to vector<49x192xf32>
      %c0_20 = arith.constant 0 : index
      %c0_21 = arith.constant 0 : index
      %48 = vector.load %arg5[%c0_20, %c0_21] : memref<49x192xf32, #tpu.memory_space<vmem>>, vector<49x192xf32>
      tpu.vector_store %arg5[%c0_20, %c0_21], %47 {strides = array<i32>} : memref<49x192xf32, #tpu.memory_space<vmem>>, vector<49x192xf32>,
    } else {
    }
    %c0 = arith.constant 0 : index
    %c0_1 = arith.constant 0 : index
    %3 = vector.load %arg2[%c0, %c0_1] : memref<560x49xbf16, #tpu.memory_space<vmem>>, vector<560x49xbf16>
    %4 = tpu.iota {dimensions = array<i32: 0>} : vector<49x49xi32>
    %5 = tpu.iota {dimensions = array<i32: 1>} : vector<49x49xi32>
    %6 = arith.cmpi eq, %4, %5 : vector<49x49xi32>
    %7 = arith.extui %6 : vector<49x49xi1> to vector<49x49xi32>
    %8 = arith.sitofp %7 : vector<49x49xi32> to vector<49x49xf32>
    %9 = arith.truncf %8 : vector<49x49xf32> to vector<49x49xbf16>
    %cst = arith.constant dense<0.000000e+00> : vector<49x560xf32>
    %10 = tpu.matmul %9, %3, %cst {dimension_numbers = #tpu.dot_dimension_numbers<[1], [1], [0], [0], [0, 0, 1, 0], [], []>} : vector<49x49xbf16>, vector<560x49xbf16>, vector<49x560xf32> -> vector<49x560xf32>
    %cst_2 = arith.constant dense<0.000000e+00> : vector<560xf32>
    %11 = vector.multi_reduction <add>, %10, %cst_2 [0] : vector<49x560xf32> to vector<560xf32>
    %12 = vector.shape_cast %11 : vector<560xf32> to vector<1x560xf32>
    %13 = arith.mulf %10, %10 : vector<49x560xf32>
    %cst_3 = arith.constant dense<0.000000e+00> : vector<560xf32>
    %14 = vector.multi_reduction <add>, %13, %cst_3 [0] : vector<49x560xf32> to vector<560xf32>
    %15 = vector.shape_cast %14 : vector<560xf32> to vector<1x560xf32>
    %cst_4 = arith.constant 0.0204081628 : f32
    %16 = vector.broadcast %cst_4 : f32 to vector<1x560xf32>
    %17 = arith.mulf %12, %16 : vector<1x560xf32>
    %cst_5 = arith.constant 0.0204081628 : f32
    %18 = vector.broadcast %cst_5 : f32 to vector<1x560xf32>
    %19 = arith.mulf %15, %18 : vector<1x560xf32>
    %20 = arith.mulf %17, %17 : vector<1x560xf32>
    %21 = arith.subf %19, %20 : vector<1x560xf32>
    %c0_6 = arith.constant 0 : index
    %c0_7 = arith.constant 0 : index
    %c0_8 = arith.constant 0 : index
    %22 = vector.load %arg1[%c0_6, %c0_7, %c0_8] : memref<1x2x560xf32, #tpu.memory_space<vmem>>, vector<1x2x560xf32>
    %23 = vector.shape_cast %22 : vector<1x2x560xf32> to vector<2x560xf32>
    %24 = vector.extract_strided_slice %23 {offsets = [0, 0], sizes = [1, 560], strides = [1, 1]} : vector<2x560xf32> to vector<1x560xf32>
    %25 = vector.extract_strided_slice %23 {offsets = [1, 0], sizes = [1, 560], strides = [1, 1]} : vector<2x560xf32> to vector<1x560xf32>
    %cst_9 = arith.constant 9.99999974E-6 : f32
    %26 = vector.broadcast %cst_9 : f32 to vector<1x560xf32>
    %27 = arith.addf %21, %26 : vector<1x560xf32>
    %28 = math.rsqrt %27 : vector<1x560xf32>
    %29 = arith.mulf %24, %28 : vector<1x560xf32>
    %30 = arith.mulf %17, %29 : vector<1x560xf32>
    %31 = arith.subf %25, %30 : vector<1x560xf32>
    %32 = vector.broadcast %29 : vector<1x560xf32> to vector<49x560xf32>
    %33 = arith.mulf %10, %32 : vector<49x560xf32>
    %34 = vector.broadcast %31 : vector<1x560xf32> to vector<49x560xf32>
    %35 = arith.addf %33, %34 : vector<49x560xf32>
    %cst_10 = arith.constant 0.000000e+00 : f32
    %36 = vector.broadcast %cst_10 : f32 to vector<49x560xf32>
    %37 = arith.maximumf %35, %36 : vector<49x560xf32>
    %38 = arith.truncf %37 : vector<49x560xf32> to vector<49x560xbf16>
    %c0_11 = arith.constant 0 : index
    %c0_12 = arith.constant 0 : index
    %39 = vector.load %arg5[%c0_11, %c0_12] : memref<49x192xf32, #tpu.memory_space<vmem>>, vector<49x192xf32>
    %c0_13 = arith.constant 0 : index
    %c0_14 = arith.constant 0 : index
    %40 = vector.load %arg3[%c0_13, %c0_14] : memref<560x192xbf16, #tpu.memory_space<vmem>>, vector<560x192xbf16>
    %cst_15 = arith.constant dense<0.000000e+00> : vector<49x192xf32>
    %41 = tpu.matmul %38, %40, %cst_15 {dimension_numbers = #tpu.dot_dimension_numbers<[1], [0], [0], [1], [0, 0, 1, 1], [], []>} : vector<49x560xbf16>, vector<560x192xbf16>, vector<49x192xf32> -> vector<49x192xf32>
    %42 = arith.addf %39, %41 : vector<49x192xf32>
    %c0_16 = arith.constant 0 : index
    %c0_17 = arith.constant 0 : index
    %43 = vector.load %arg5[%c0_16, %c0_17] : memref<49x192xf32, #tpu.memory_space<vmem>>, vector<49x192xf32>
    tpu.vector_store %arg5[%c0_16, %c0_17], %42 {strides = array<i32>} : memref<49x192xf32, #tpu.memory_space<vmem>>, vector<49x192xf32>,
    %c2_i32 = arith.constant 2 : i32
    %44 = arith.cmpi eq, %arg0, %c2_i32 : i32
    %45 = arith.extui %44 : i1 to i32
    %c0_i32_18 = arith.constant 0 : i32
    %46 = arith.cmpi ne, %45, %c0_i32_18 : i32
    scf.if %46 {
      %c0_19 = arith.constant 0 : index
      %c0_20 = arith.constant 0 : index
      %47 = vector.load %arg5[%c0_19, %c0_20] : memref<49x192xf32, #tpu.memory_space<vmem>>, vector<49x192xf32>
      %48 = tpu.iota {dimensions = array<i32: 0>} : vector<192x192xi32>
      %49 = tpu.iota {dimensions = array<i32: 1>} : vector<192x192xi32>
      %50 = arith.cmpi eq, %48, %49 : vector<192x192xi32>
      %51 = arith.extui %50 : vector<192x192xi1> to vector<192x192xi32>
      %52 = arith.sitofp %51 : vector<192x192xi32> to vector<192x192xf32>
      %cst_21 = arith.constant 1.000000e+00 : f32
      %53 = vector.broadcast %cst_21 : f32 to vector<192x192xf32>
      %54 = arith.mulf %53, %52 : vector<192x192xf32>
      %cst_22 = arith.constant dense<0.000000e+00> : vector<192x49xf32>
      %55 = tpu.matmul %54, %47, %cst_22 {dimension_numbers = #tpu.dot_dimension_numbers<[1], [1], [0], [0], [0, 0, 1, 0], [], []>} : vector<192x192xf32>, vector<49x192xf32>, vector<192x49xf32> -> vector<192x49xf32>
      %c0_23 = arith.constant 0 : index
      %c0_24 = arith.constant 0 : index
      %56 = vector.load %arg4[%c0_23, %c0_24] : memref<192x49xf32, #tpu.memory_space<vmem>>, vector<192x49xf32>
      tpu.vector_store %arg4[%c0_23, %c0_24], %55 {strides = array<i32>} : memref<192x49xf32, #tpu.memory_space<vmem>>, vector<192x49xf32>,
    } else {
    }
    return
  }
  func.func @transform_0(%arg0: i32) -> (i32, i32, i32) {
    %c0_i32 = arith.constant 0 : i32
    %c0_i32_0 = arith.constant 0 : i32
    %c0_i32_1 = arith.constant 0 : i32
    return %arg0, %c0_i32, %c0_i32_0 : i32, i32, i32
  }
  func.func @transform_1(%arg0: i32) -> (i32, i32) {
    %c0_i32 = arith.constant 0 : i32
    %c0_i32_0 = arith.constant 0 : i32
    return %arg0, %c0_i32 : i32, i32
  }
  func.func @transform_2(%arg0: i32) -> (i32, i32) {
    %c0_i32 = arith.constant 0 : i32
    %c0_i32_0 = arith.constant 0 : i32
    return %arg0, %c0_i32 : i32, i32
  }
  func.func @transform_3(%arg0: i32) -> (i32, i32) {
    %c0_i32 = arith.constant 0 : i32
    %c0_i32_0 = arith.constant 0 : i32
    %c0_i32_1 = arith.constant 0 : i32
    return %c0_i32, %c0_i32_0 : i32, i32
  }
}

</mosaic_0001>

<bundles_post_ra>
// kernel: tpu_custom_call.1
= control target key start
LH: loop header
LB: loop body
LE: loop exit
PB: predicated region body
PF: predicated region fallthrough
CT: control target
= control target key end

     0   :  { %s3063_s12 = smov 0   ;;  %s4021_s0 = inlined_call_operand.vmem [shape: f32[3,2,560], index: 0, kind: input, shape index: {}]   ;;  %s4022_s1 = inlined_call_operand.vmem [shape: bf16[1680,49], index: 1, kind: input, shape index: {}]   ;;  %s4023_s2 = inlined_call_operand.vmem [shape: bf16[1680,192], index: 2, kind: input, shape index: {}]   ;;  %s4024_s3 = inlined_call_operand.vmem [shape: f32[192,49], index: 3, kind: output, shape index: {}]  }
   0x1 LB: > { %s3069_s13 = sadd.s32 4294967295, %s3035_s12   ;;  %p2537_p0 = scmp.ge.s32.totalorder %s3035_s12, 1  ;;  %s3035_s12 = sphi %s3063_s12, %s13_s12  }
   0x2   : > { %p155_p1 = scmp.lt.s32.totalorder %s3035_s12, 4 }
   0x4   : > { %p156_p2 = pnand %p2537_p0, %p155_p1 }
   0x6   : > { %159 = sbr.rel (%p156_p2) target bundleno = 1060 (0x424), region = 32 }
   0xd   : > { %p185_p3 = scmp.lt.s32.totalorder %s3069_s13, 2  ;;  %s190_s14 = smul.u32 70, %s3069_s13 }
   0xe   : > { %p2542_p5 = scmp.ne.s32.totalorder %s3069_s13, 0 }
   0xf   : > { %s186_s15 = scalar_select %p185_p3, %s3069_s13, 2 }
  0x10   : > { %p191_p4 = scmp.lt.s32.totalorder %s190_s14, 209  ;;  %207 = sbr.rel (%p2542_p5) target bundleno = 25 (0x19), region = 36  ;;  %vm209_vm0 = vcmask (!%p2542_p5), 523264   ;;  %vm222_vm1 = vcmask (!%p2542_p5), 516096   ;;  %v3037_v0 = vmov (!%p2542_p5), 0.0  }
  0x11   : > { %s2864_s16 = smul.u32 10, %s186_s15  ;;  %208 = vst [vmem:[#allocation2] sm:$0xff] (!%p2542_p5), %v3037_v0  ;;  %211 = vst [vmem:[#allocation2 + $0x10] sm:$0xff] (!%p2542_p5), %v3037_v0 }
  0x12   : > { %s4078_s14 = smov (!%p191_p4, %s190_s14), 209  ;;  %213 = vst [vmem:[#allocation2 + $0x20] sm:$0xff] (!%p2542_p5), %v3037_v0  ;;  %215 = vst [vmem:[#allocation2 + $0x30] sm:$0xff] (!%p2542_p5), %v3037_v0 }
  0x13   : > { %s3079_s19 = scalar_lea.vmem %s4021_s0, %s2864_s16  ;;  %s2539_s20 = sshll.u32 %s4078_s14, 2  ;;  %217 = vst [vmem:[#allocation2 + $0x40] sm:$0xff] (!%p2542_p5), %v3037_v0  ;;  %219 = vst [vmem:[#allocation2 + $0x50] sm:$0xff] (!%p2542_p5), %v3037_v0 }
  0x14   : > { %s2722_s21 = sshll.u32 %s4078_s14, 3  ;;  %s3084_s24 = scalar_lea.vmem %s4022_s1, %s2539_s20  ;;  %221 = vst [vmem:[#allocation2 + $0x60] sm:$0x1] (!%p2542_p5), %v3037_v0  ;;  %210 = vst.msk [vmem:[#allocation2 + $0x8] sm:$0xff] (!%p2542_p5), %vm209_vm0, %v3037_v0 }
  0x15   : > { %s3089_s27 = scalar_lea.vmem %s4023_s2, %s2722_s21  ;;  %212 = vst.msk [vmem:[#allocation2 + $0x18] sm:$0xff] (!%p2542_p5), %vm209_vm0, %v3037_v0  ;;  %214 = vst.msk [vmem:[#allocation2 + $0x28] sm:$0xff] (!%p2542_p5), %vm209_vm0, %v3037_v0 }
  0x16   : > { %216 = vst.msk [vmem:[#allocation2 + $0x38] sm:$0xff] (!%p2542_p5), %vm209_vm0, %v3037_v0  ;;  %218 = vst.msk [vmem:[#allocation2 + $0x48] sm:$0xff] (!%p2542_p5), %vm209_vm0, %v3037_v0 }
  0x17   : > { %220 = vst.msk [vmem:[#allocation2 + $0x58] sm:$0xff] %vm209_vm0, %v3037_v0 }
  0x18   : > { %223 = vst.msk [vmem:[#allocation2 + $0x68] sm:$0x1] %vm222_vm1, %v3037_v0 }
  0x19 PF: > { %v2879_v1 = vld [vmem:[%s3084_s24 + $0x40] sm:$0xff]   ;;  %vm504_vm2 = vcmask 400384   ;;  %v294_v2 = vlaneseq  ;;  %v2881_v4 = vld [vmem:[%s3084_s24 + $0x48] sm:$0xff]   ;;  %v2883_v11 = vld [vmem:[%s3084_s24 + $0x50] sm:$0xff]   ;;  %v3038_v12 = vmov 0.0   ;;  %vm833_vm10 = vcmask 1040384  }
  0x1a   : > { %v2880_v3 = vld [vmem:[%s3084_s24] sm:$0xff]   ;;  %2845 = vmatprep.subr.msk.bf16.mxu0 %vm504_vm2, %v2879_v1  ;;  %v2882_v7 = vld [vmem:[%s3084_s24 + $0x8] sm:$0xff]   ;;  %v2884_v15 = vld [vmem:[%s3084_s24 + $0x10] sm:$0xff]   ;;  %vm881_vm11 = vcmask 392192   ;;  %vm893_vm12 = vcmask 385024   ;;  %vm2006_vm13 = vcmask 523264  }
  0x1b   : > { %v3096_v5 = vshrl.u32 %v294_v2, 7  ;;  %v518_v6 = vsel %vm504_vm2, %v2880_v3, 0  ;;  %v3104_v9 = vand.u32 127, %v294_v2  ;;  %v521_v10 = vsel %vm504_vm2, %v2882_v7, 0  ;;  %v2885_v18 = vld [vmem:[%s3084_s24 + $0x58] sm:$0xff]   ;;  %v2887_v21 = vld [vmem:[%s3084_s24 + $0x60] sm:$0xff]  }
  0x1c   : > { %2724 = vmatpush3.bf16.xpose.msra.mxu0 %v518_v6  ;;  %v524_v17 = vsel %vm504_vm2, %v2884_v15, 0  ;;  %v2886_v19 = vld [vmem:[%s3084_s24 + $0x18] sm:$0xff]   ;;  %v2888_v24 = vld [vmem:[%s3084_s24 + $0x20] sm:$0xff]   ;;  %v2889_v26 = vld [vmem:[%s3084_s24 + $0x68] sm:$0xff]   ;;  %vm2019_vm14 = vcmask 516096   ;;  %p2671_p6 = scmp.ne.s32.totalorder %s3069_s13, 2 }
  0x1d   : > { %2846 = vmatprep.subr.msk.bf16.mxu0 %vm504_vm2, %v2881_v4  ;;  %v3102_v8 = vadd.s32 8, %v3096_v5  ;;  %4044 = vst [vmem:[#allocation4_spill] sm:$0xff] %v3104_v9  ;;  %vm304_vm3 = vcmp.eq.s32.totalorder %v3096_v5, %v3104_v9  ;;  %v3129_v20 = vadd.s32 48, %v3096_v5  ;;  %v527_v22 = vsel %vm504_vm2, %v2886_v19, 0  ;;  %v2890_v27 = vld [vmem:[%s3084_s24 + $0x28] sm:$0xff]   ;;  %v2891_v28 = vld [vmem:[%s3084_s24 + $0x70] sm:$0xff]   ;;  %vm3790_vm15 = vmpackc.low (!%p2671_p6), %vm2006_vm13, %vm2006_vm13 }
  0x1e   : > { %v2543_v13 = vsel %vm304_vm3, 1.0, %v3038_v12  ;;  %v530_v25 = vsel %vm504_vm2, %v2888_v24, 0  ;;  %v533_v29 = vsel %vm504_vm2, %v2890_v27, 0  ;;  %v2892_v30 = vld [vmem:[%s3084_s24 + $0x30] sm:$0xff]   ;;  %v2893_v31 = vld [vmem:[%s3084_s24 + $0x78] sm:$0xff]   ;;  %v3153_v34 = vadd.s32 16, %v3096_v5 }
  0x1f   : > { %4043 = vst [vmem:[#allocation3_spill] sm:$0xff] %v3102_v8  ;;  %vm305_vm4 = vcmp.eq.s32.totalorder %v3102_v8, %v3104_v9  ;;  %4045 = vst [vmem:[#allocation5_spill] sm:$0xff] %v3129_v20  ;;  %vm310_vm5 = vcmp.eq.s32.totalorder %v3129_v20, %v3104_v9  ;;  %v536_v32 = vsel %vm504_vm2, %v2892_v30, 0  ;;  %v2894_v33 = vld [vmem:[%s3084_s24 + $0x38] sm:$0xff]   ;;  %v3156_v35 = vadd.s32 24, %v3096_v5  ;;  %v2895_v36 = vld [vmem:[%s3084_s24 + $0xc0] sm:$0xff]  }
  0x20   : > { %v2544_v14 = vsel %vm305_vm4, 1.0, %v3038_v12  ;;  %v2549_v23 = vsel %vm310_vm5, 1.0, %v3038_v12  ;;  %4046 = vst [vmem:[#allocation6_spill] sm:$0xff] %v3153_v34  ;;  %v539_v37 = vsel %vm504_vm2, %v2894_v33, 0  ;;  %vm306_vm6 = vcmp.eq.s32.totalorder %v3153_v34, %v3104_v9  ;;  %v2896_v38 = vld [vmem:[%s3084_s24 + $0x80] sm:$0xff]   ;;  %v2897_v45 = vld [vmem:[%s3084_s24 + $0xc8] sm:$0xff]  }
  0x21   : > { %v3120_v16 = vpack.c.bf16 %v2544_v14, %v2543_v13  ;;  %4047 = vst [vmem:[#allocation7_spill] sm:$0xff] %v3156_v35  ;;  %vm307_vm7 = vcmp.eq.s32.totalorder %v3156_v35, %v3104_v9  ;;  %v2545_v39 = vsel %vm306_vm6, 1.0, %v3038_v12  ;;  %v3173_v41 = vadd.s32 32, %v3096_v5  ;;  %v2898_v46 = vld [vmem:[%s3084_s24 + $0x88] sm:$0xff]   ;;  %v2899_v51 = vld [vmem:[%s3084_s24 + $0xd0] sm:$0xff]   ;;  %v2901_v55 = vld [vmem:[%s3084_s24 + $0xd8] sm:$0xff]  }
  0x22   : > { %v2546_v40 = vsel %vm307_vm7, 1.0, %v3038_v12  ;;  %v3176_v42 = vadd.s32 40, %v3096_v5  ;;  %v566_v44 = vsel %vm504_vm2, %v2896_v38, 0  ;;  %v569_v50 = vsel %vm504_vm2, %v2898_v46, 0  ;;  %v2900_v52 = vld [vmem:[%s3084_s24 + $0x90] sm:$0xff]   ;;  %v2902_v56 = vld [vmem:[%s3084_s24 + $0x98] sm:$0xff]  }
  0x23   : > { %2739 = vmatprep.mubr.msk.bf16.mxu0 %vm504_vm2, %v3120_v16  ;;  %4048 = vst [vmem:[#allocation8_spill] sm:$0xff] %v3173_v41  ;;  %v3178_v43 = vpack.c.bf16 %v2546_v40, %v2545_v39  ;;  %vm308_vm8 = vcmp.eq.s32.totalorder %v3173_v41, %v3104_v9  ;;  %v328_v53 = vpack.c.bf16 %v2549_v23, %v2549_v23  ;;  %v572_v54 = vsel %vm504_vm2, %v2900_v52, 0  ;;  %v2903_v58 = vld [vmem:[%s3084_s24 + $0xe0] sm:$0xff]   ;;  %v2905_v61 = vld [vmem:[%s3084_s24 + $0xe8] sm:$0xff]   ;;  %v2907_v0 = vld [vmem:[%s3084_s24 + $0xf0] sm:$0xff]  }
  0x24   : > { %2726 = vmatpush3.bf16.xpose.msra.mxu0 %v521_v10  ;;  %4049 = vst [vmem:[#allocation9_spill] sm:$0xff] %v3176_v42  ;;  %vm309_vm9 = vcmp.eq.s32.totalorder %v3176_v42, %v3104_v9  ;;  %v2547_v47 = vsel %vm308_vm8, 1.0, %v3038_v12  ;;  %v575_v57 = vsel %vm504_vm2, %v2902_v56, 0  ;;  %v2904_v59 = vld [vmem:[%s3084_s24 + $0xa0] sm:$0xff]   ;;  %v2906_v62 = vld [vmem:[%s3084_s24 + $0xa8] sm:$0xff]   ;;  %v2908_v1 = vld [vmem:[%s3084_s24 + $0xb0] sm:$0xff]  }
  0x25   : > { %2847 = vmatprep.subr.msk.bf16.mxu0 %vm504_vm2, %v2883_v11  ;;  %v2548_v48 = vsel %vm309_vm9, 1.0, %v3038_v12  ;;  %v578_v60 = vsel %vm504_vm2, %v2904_v59, 0  ;;  %v581_v63 = vsel %vm504_vm2, %v2906_v62, 0  ;;  %v584_v2 = vsel %vm504_vm2, %v2908_v1, 0  ;;  %v2909_v3 = vld [vmem:[%s3084_s24 + $0xf8] sm:$0xff]   ;;  %v2911_v7 = vld [vmem:[%s3084_s24 + $0x100] sm:$0xff]  }
  0x26   : > { %v327_v49 = vpack.c.bf16 %v2548_v48, %v2547_v47  ;;  %v2910_v4 = vld [vmem:[%s3084_s24 + $0xb8] sm:$0xff]   ;;  %v614_v10 = vsel %vm504_vm2, %v2911_v7, 0  ;;  %v2912_v11 = vld [vmem:[%s3084_s24 + $0x108] sm:$0xff]   ;;  %v2913_v13 = vld [vmem:[%s3084_s24 + $0x110] sm:$0xff]  }
  0x27   : > { %v587_v6 = vsel %vm504_vm2, %v2910_v4, 0  ;;  %v617_v12 = vsel %vm504_vm2, %v2912_v11, 0  ;;  %v620_v14 = vsel %vm504_vm2, %v2913_v13, 0  ;;  %v2914_v15 = vld [vmem:[%s3089_s27 + $0x4] ss:$8 sps:$4 sm:$0xff]  }
  0x28   : > { %1778 = vmatprep.subr.bf16.mxu1 %v2914_v15  ;;  %v2919_v19 = vld [vmem:[%s3089_s27 + $0x10] ss:$8 sps:$4 sm:$0xff]   ;;  %v2926_v24 = vld [vmem:[%s3089_s27 + $0x44] ss:$8 sps:$4 sm:$0xff]   ;;  %v2935_v30 = vld [vmem:[%s3089_s27 + $0x74] ss:$8 sps:$4 sm:$0xff]  }
  0x29   : > { %v2925_v23 = vld [vmem:[%s3089_s27 + $0x30] ss:$8 sps:$4 sm:$0xff]   ;;  %v2940_v33 = vld [vmem:[%s3089_s27 + $0x80] ss:$8 sps:$4 sm:$0xff]   ;;  %v2944_v47 = vld [vmem:[%s3089_s27 + $0xa4] ss:$8 sps:$4 sm:$0xff]  }
  0x2a   : > { %v2931_v27 = vld [vmem:[%s3089_s27 + $0x50] ss:$8 sps:$4 sm:$0xff]  }
  0x2b   : > { %v2943_v38 = vld [vmem:[%s3089_s27 + $0x90] ss:$8 sps:$4 sm:$0xff]  }
  0x2c   : > { %2728 = vmatpush3.bf16.xpose.msra.mxu0 %v524_v17  ;;  %v2916_v17 = vld [vmem:[%s3089_s27] ss:$8 sps:$4 sm:$0xff]   ;;  %v2949_v56 = vld [vmem:[%s3089_s27 + $0xb0] ss:$8 sps:$4 sm:$0xff]  }
  0x2d   : > { %2848 = vmatprep.subr.msk.bf16.mxu0 %vm504_vm2, %v2885_v18  ;;  %1779 = vmatpush1.bf16.msra.mxu1 %v2916_v17  ;;  %v2917_v18 = vld [vmem:[%s3089_s27 + $0x14] ss:$8 sps:$4 sm:$0xff]   ;;  %v2955_v15 = vld [vmem:[%s3089_s27 + $0xd0] ss:$8 sps:$4 sm:$0xff]  }
  0x2e   : > { %1780 = vmatprep.subr.bf16.mxu1 %v2917_v18 }
  0x31   : > { %1781 = vmatpush1.bf16.msra.mxu1 %v2919_v19 }
  0x34   : > { %2730 = vmatpush3.bf16.xpose.msra.mxu0 %v527_v22  ;;  %v2923_v22 = vld [vmem:[%s3089_s27 + $0x34] ss:$8 sps:$4 sm:$0xff]  }
  0x35   : > { %2849 = vmatprep.subr.msk.bf16.mxu0 %vm504_vm2, %v2887_v21  ;;  %v2922_v21 = vld [vmem:[%s3089_s27 + $0x20] ss:$8 sps:$4 sm:$0xff]  }
  0x3c   : > { %2732 = vmatpush3.bf16.xpose.msra.mxu0 %v530_v25  ;;  %v2928_v25 = vld [vmem:[%s3089_s27 + $0x40] ss:$8 sps:$4 sm:$0xff]  }
  0x3d   : > { %2850 = vmatprep.subr.msk.bf16.mxu0 %vm504_vm2, %v2889_v26  ;;  %v2929_v26 = vld [vmem:[%s3089_s27 + $0x54] ss:$8 sps:$4 sm:$0xff]  }
  0x44   : > { %2734 = vmatpush3.bf16.xpose.msra.mxu0 %v533_v29  ;;  %v2934_v29 = vld [vmem:[%s3089_s27 + $0x60] ss:$8 sps:$4 sm:$0xff]  }
  0x45   : > { %2851 = vmatprep.subr.msk.bf16.mxu0 %vm504_vm2, %v2891_v28  ;;  %v2932_v28 = vld [vmem:[%s3089_s27 + $0x64] ss:$8 sps:$4 sm:$0xff]  }
  0x4c   : > { %2736 = vmatpush3.bf16.xpose.msra.mxu0 %v536_v32  ;;  %v2938_v32 = vld [vmem:[%s3089_s27 + $0x84] ss:$8 sps:$4 sm:$0xff]  }
  0x4d   : > { %2852 = vmatprep.subr.msk.bf16.mxu0 %vm504_vm2, %v2893_v31  ;;  %v2937_v31 = vld [vmem:[%s3089_s27 + $0x70] ss:$8 sps:$4 sm:$0xff]  }
  0x54   : > { %2738 = vmatpush3.bf16.xpose.msra.mxu0 %v539_v37 }
  0x55   : > { %2853 = vmatprep.subr.msk.bf16.mxu0 %vm504_vm2, %v2895_v36  ;;  %v2941_v36 = vld [vmem:[%s3089_s27 + $0x94] ss:$8 sps:$4 sm:$0xff]  }
  0x5b   : > { %2740 = vmatmul.mubr.msk.bf16.vlgmr.msra.gmra.mrb[0].mxu0 %vm504_vm2, %v3120_v16 }
  0x5c   : > { %2748 = vmatpush3.bf16.xpose.msra.mxu0 %v566_v44  ;;  %2741 = vmatprep.mubr.msk.bf16.mxu0 %vm504_vm2, %v3178_v43 }
  0x5d   : > { %2854 = vmatprep.subr.msk.bf16.mxu0 %vm504_vm2, %v2897_v45 }
  0x63   : > { %2742 = vmatmul.mubr.msk.bf16.gmra.mrb[4].mxu0 %vm504_vm2, %v3178_v43 }
  0x64   : > { %2750 = vmatpush3.bf16.xpose.msra.mxu0 %v569_v50  ;;  %2743 = vmatprep.mubr.msk.bf16.mxu0 %vm504_vm2, %v327_v49 }
  0x65   : > { %2855 = vmatprep.subr.msk.bf16.mxu0 %vm504_vm2, %v2899_v51  ;;  %v2946_v51 = vld [vmem:[%s3089_s27 + $0xa0] ss:$8 sps:$4 sm:$0xff]  }
  0x6b   : > { %2744 = vmatmul.mubr.msk.bf16.gmra.mrb[8].mxu0 %vm504_vm2, %v327_v49 }
  0x6c   : > { %2752 = vmatpush3.bf16.xpose.msra.mxu0 %v572_v54  ;;  %2745 = vmatprep.mubr.msk.bf16.mxu0 %vm504_vm2, %v328_v53  ;;  %v2947_v54 = vld [vmem:[%s3089_s27 + $0xb4] ss:$8 sps:$4 sm:$0xff]  }
  0x6d   : > { %2856 = vmatprep.subr.msk.bf16.mxu0 %vm504_vm2, %v2901_v55 }
  0x73   : > { %2746 = vmatmul.mubr.msk.bf16.gmra.mrb[12].mxu0 %vm504_vm2, %v328_v53 }
  0x74   : > { %2754 = vmatpush3.bf16.xpose.msra.mxu0 %v575_v57  ;;  %2763 = vmatprep.mubr.msk.bf16.mxu0 %vm504_vm2, %v3120_v16 }
  0x75   : > { %2857 = vmatprep.subr.msk.bf16.mxu0 %vm504_vm2, %v2903_v58 }
  0x7c   : > { %2756 = vmatpush3.bf16.xpose.msra.mxu0 %v578_v60 }
  0x7d   : > { %2858 = vmatprep.subr.msk.bf16.mxu0 %vm504_vm2, %v2905_v61 }
  0x84   : > { %2758 = vmatpush3.bf16.xpose.msra.mxu0 %v581_v63 }
  0x85   : > { %2859 = vmatprep.subr.msk.bf16.mxu0 %vm504_vm2, %v2907_v0 }
  0x8c   : > { %2760 = vmatpush3.bf16.xpose.msra.mxu0 %v584_v2 }
  0x8d   : > { %2860 = vmatprep.subr.msk.bf16.mxu0 %vm504_vm2, %v2909_v3  ;;  %v2950_v3 = vld [vmem:[%s3089_s27 + $0xc4] ss:$8 sps:$4 sm:$0xff]  }
  0x94   : > { %2762 = vmatpush3.bf16.xpose.msra.mxu0 %v587_v6 }
  0x95   : > { %2861 = vmatprep.subr.msk.bf16.mxu0 %vm504_vm2, %v2911_v7 }
  0x9b   : > { %2764 = vmatmul.mubr.msk.bf16.vlgmr.msra.gmra.mrb[16].mxu0 %vm504_vm2, %v3120_v16 }
  0x9c   : > { %2765 = vmatprep.mubr.msk.bf16.mxu0 %vm504_vm2, %v3178_v43  ;;  %2779 = vmatpush3.bf16.xpose.msra.mxu0 %v614_v10  ;;  %v2952_v10 = vld [vmem:[%s3089_s27 + $0xc0] ss:$8 sps:$4 sm:$0xff]  }
  0x9d   : > { %2862 = vmatprep.subr.msk.bf16.mxu0 %vm504_vm2, %v2912_v11 }
  0xa3   : > { %2766 = vmatmul.mubr.msk.bf16.gmra.mrb[20].mxu0 %vm504_vm2, %v3178_v43 }
  0xa4   : > { %2767 = vmatprep.mubr.msk.bf16.mxu0 %vm504_vm2, %v327_v49  ;;  %2781 = vmatpush3.bf16.xpose.msra.mxu0 %v617_v12 }
  0xa5   : > { %2863 = vmatprep.subr.msk.bf16.mxu0 %vm504_vm2, %v2913_v13  ;;  %v2953_v13 = vld [vmem:[%s3089_s27 + $0xd4] ss:$8 sps:$4 sm:$0xff]  }
  0xab   : > { %2768 = vmatmul.mubr.msk.bf16.gmra.mrb[24].mxu0 %vm504_vm2, %v327_v49 }
  0xac   : > { %2769 = vmatprep.mubr.msk.bf16.mxu0 %vm504_vm2, %v328_v53  ;;  %2783 = vmatpush3.bf16.xpose.msra.mxu0 %v620_v14 }
  0xb3   : > { %2770 = vmatmul.mubr.msk.bf16.gmra.mrb[28].mxu0 %vm504_vm2, %v328_v53 }
  0xb4   : > { %2784 = vmatprep.mubr.msk.bf16.mxu0 %vm504_vm2, %v3120_v16  ;;  %v2920_v16 = vld [vmem:[%s3089_s27 + $0x24] ss:$8 sps:$4 sm:$0xff]  }
  0xb5   : > { %1782 = vmatprep.subr.bf16.mxu1 %v2920_v16 }
  0xb6   : > { %1783 = vmatpush1.bf16.msra.mxu1 %v2922_v21 }
  0xb7   : > { %1784 = vmatprep.subr.bf16.mxu1 %v2923_v22 }
  0xba   : > { %1785 = vmatpush1.bf16.msra.mxu1 %v2925_v23 }
  0xbb   : > { %2785 = vmatmul.mubr.msk.bf16.vlgmr.msra.gmra.mrb[32].mxu0 %vm504_vm2, %v3178_v43  ;;  %1786 = vmatprep.subr.bf16.mxu1 %v2926_v24 }
  0xbc   : > { %2788 = vmatprep.mubr.msk.bf16.mxu0 %vm504_vm2, %v327_v49 }
  0xbe   : > { %1787 = vmatpush1.bf16.msra.mxu1 %v2928_v25 }
  0xbf   : > { %1788 = vmatprep.subr.bf16.mxu1 %v2929_v26 }
  0xc2   : > { %1789 = vmatpush1.bf16.msra.mxu1 %v2931_v27  ;;  %v2956_v27 = vld [vmem:[%s3089_s27 + $0xe4] ss:$8 sps:$4 sm:$0xff]  }
  0xc3   : > { %2789 = vmatmul.mubr.msk.bf16.gmra.mrb[36].mxu0 %vm504_vm2, %v328_v53  ;;  %1790 = vmatprep.subr.bf16.mxu1 %v2932_v28 }
  0xc6   : > { %1791 = vmatpush1.bf16.msra.mxu1 %v2934_v29 }
  0xc7   : > { %1792 = vmatprep.subr.bf16.mxu1 %v2935_v30 }
  0xca   : > { %1793 = vmatpush1.bf16.msra.mxu1 %v2937_v31  ;;  %v2958_v31 = vld [vmem:[%s3089_s27 + $0xe0] ss:$8 sps:$4 sm:$0xff]  }
  0xcb   : > { %1794 = vmatprep.subr.bf16.mxu1 %v2938_v32 }
  0xce   : > { %1795 = vmatpush1.bf16.msra.mxu1 %v2940_v33 }
  0xcf   : > { %1796 = vmatprep.subr.bf16.mxu1 %v2941_v36  ;;  %v2959_v36 = vld [vmem:[%s3089_s27 + $0xf4] ss:$8 sps:$4 sm:$0xff]  }
  0xd2   : > { %1797 = vmatpush1.bf16.msra.mxu1 %v2943_v38 }
  0xd3   : > { %1798 = vmatprep.subr.bf16.mxu1 %v2944_v47 }
  0xd6   : > { %1799 = vmatpush1.bf16.msra.mxu1 %v2946_v51 }
  0xd7   : > { %1800 = vmatprep.subr.bf16.mxu1 %v2947_v54 }
  0xda   : > { %1801 = vmatpush1.bf16.msra.mxu1 %v2949_v56 }
  0xdb   : > { %1802 = vmatprep.subr.bf16.mxu1 %v2950_v3 }
  0xde   : > { %1803 = vmatpush1.bf16.msra.mxu1 %v2952_v10 }
  0xdf   : > { %1804 = vmatprep.subr.bf16.mxu1 %v2953_v13 }
  0xe2   : > { %1805 = vmatpush1.bf16.msra.mxu1 %v2955_v15 }
  0xe3   : > { %1806 = vmatprep.subr.bf16.mxu1 %v2956_v27 }
  0xe6   : > { %1807 = vmatpush1.bf16.msra.mxu1 %v2958_v31 }
  0xe7   : > { %1808 = vmatprep.subr.bf16.mxu1 %v2959_v36 }
 0x12e   : > { %v3275_v37 = vpop.f32.mrb[0].mxu0 }
 0x12f   : > { %v902_v39 = vmul.f32 %v3275_v37, %v3275_v37  ;;  %v3280_v40 = vpop.f32.mrb[1].mxu0 }
 0x130   : > { %v3282_v43 = vpop.f32.mrb[2].mxu0  ;;  %v903_v48 = vmul.f32 %v3280_v40, %v3280_v40 }
 0x131   : > { %v828_v44 = vadd.f32 %v3282_v43, %v3275_v37  ;;  %v907_v45 = vmul.f32 %v3282_v43, %v3282_v43  ;;  %v3288_v46 = vpop.f32.mrb[3].mxu0 }
 0x132   : > { %v842_v49 = vadd.f32 %v3288_v46, %v3280_v40  ;;  %v908_v50 = vmul.f32 %v3288_v46, %v3288_v46 }
 0x133   : > { %v937_v52 = vadd.f32 %v907_v45, %v902_v39  ;;  %v2961_v39 = vld [vmem:[%s3089_s27 + $0xf0] ss:$8 sps:$4 sm:$0xff]  }
 0x134   : > { %v950_v53 = vadd.f32 %v908_v50, %v903_v48  ;;  %1809 = vmatpush1.bf16.msra.mxu1 %v2961_v39 }
 0x136   : > { %v3299_v55 = vpop.f32.mrb[4].mxu0 }
 0x137   : > { %v829_v57 = vadd.f32 %v828_v44, %v3299_v55  ;;  %v912_v58 = vmul.f32 %v3299_v55, %v3299_v55  ;;  %v3305_v59 = vpop.f32.mrb[5].mxu0 }
 0x138   : > { %v843_v60 = vadd.f32 %v842_v49, %v3305_v59  ;;  %v913_v61 = vmul.f32 %v3305_v59, %v3305_v59  ;;  %v3310_v62 = vpop.f32.mrb[6].mxu0 }
 0x139   : > { %v938_v63 = vadd.f32 %v937_v52, %v912_v58  ;;  %v830_v0 = vadd.f32 %v829_v57, %v3310_v62  ;;  %v917_v1 = vmul.f32 %v3310_v62, %v3310_v62  ;;  %v3315_v2 = vpop.f32.mrb[7].mxu0 }
 0x13a   : > { %v951_v4 = vadd.f32 %v950_v53, %v913_v61  ;;  %v844_v6 = vadd.f32 %v843_v60, %v3315_v2  ;;  %v918_v7 = vmul.f32 %v3315_v2, %v3315_v2  ;;  %v2964_v60 = vld [vmem:[%s3089_s27 + $0x104] ss:$8 sps:$4 sm:$0xff]  }
 0x13b   : > { %v939_v11 = vadd.f32 %v938_v63, %v917_v1  ;;  %1849 = vmatprep.subr.bf16.mxu1 %v2964_v60 }
 0x13c   : > { %v952_v12 = vadd.f32 %v951_v4, %v918_v7 }
 0x13e   : > { %v3323_v14 = vpop.f32.mrb[8].mxu0 }
 0x13f   : > { %v831_v17 = vadd.f32 %v830_v0, %v3323_v14  ;;  %v922_v18 = vmul.f32 %v3323_v14, %v3323_v14  ;;  %v3329_v19 = vpop.f32.mrb[9].mxu0 }
 0x140   : > { %v845_v16 = vadd.f32 %v844_v6, %v3329_v19  ;;  %v923_v21 = vmul.f32 %v3329_v19, %v3329_v19  ;;  %v3334_v22 = vpop.f32.mrb[10].mxu0 }
 0x141   : > { %v940_v23 = vadd.f32 %v939_v11, %v922_v18  ;;  %v832_v24 = vadd.f32 %v831_v17, %v3334_v22  ;;  %v927_v25 = vmul.f32 %v3334_v22, %v3334_v22  ;;  %v3339_v26 = vpop.f32.mrb[11].mxu0 }
 0x142   : > { %v953_v28 = vadd.f32 %v952_v12, %v923_v21  ;;  %v846_v29 = vadd.f32 %v845_v16, %v3339_v26  ;;  %v928_v30 = vmul.f32 %v3339_v26, %v3339_v26 }
 0x143   : > { %v941_v32 = vadd.f32 %v940_v23, %v927_v25 }
 0x144   : > { %v954_v33 = vadd.f32 %v953_v28, %v928_v30 }
 0x146   : > { %v3347_v38 = vpop.f32.mrb[12].mxu0 }
 0x147   : > { %v834_v44 = vsel %vm833_vm10, %v3347_v38, 0.0  ;;  %v932_v45 = vmul.f32 %v3347_v38, %v3347_v38  ;;  %v3354_v47 = vpop.f32.mrb[13].mxu0 }
 0x148   : > { %v835_v48 = vadd.f32 %v834_v44, %v832_v24  ;;  %v847_v49 = vsel %vm833_vm10, %v3354_v47, 0.0  ;;  %v933_v50 = vmul.f32 %v3354_v47, %v3354_v47  ;;  %v690_v51 = vpop.f32.mrb[14].mxu0 }
 0x149   : > { %v942_v52 = vsel %vm833_vm10, %v932_v45, 0.0  ;;  %v848_v53 = vadd.f32 %v847_v49, %v846_v29  ;;  %v691_v54 = vpop.f32.mrb[15].mxu0  ;;  %v3372_v51 = vld [vmem:[%s3089_s27 + $0x200] ss:$8 sps:$4 sm:$0xff]  }
 0x14a   : > { %v836_v56 = vrot.slane %v835_v48, 4  ;;  %v943_v57 = vadd.f32 %v942_v52, %v941_v32  ;;  %v955_v58 = vsel %vm833_vm10, %v933_v50, 0.0  ;;  %4050 = vst [vmem:[#allocation10_spill] sm:$0xff] %v3372_v51  ;;  %v3375_v52 = vld [vmem:[%s3089_s27 + $0x204] ss:$8 sps:$4 sm:$0xff]  }
 0x14b   : > { %v849_v61 = vrot.slane %v848_v53, 4  ;;  %v956_v63 = vadd.f32 %v955_v58, %v954_v33  ;;  %4051 = vst [vmem:[#allocation11_spill] sm:$0xff] %v3375_v52  ;;  %1920 = vmatprep.subr.bf16.mxu0 %v3375_v52  ;;  %v3383_v54 = vld [vmem:[%s3089_s27 + $0x214] ss:$8 sps:$4 sm:$0xff]  }
 0x14c   : > { %v837_v0 = vadd.f32 %v836_v56, %v835_v48  ;;  %v944_v1 = vrot.slane %v943_v57, 4  ;;  %1921 = vmatpush1.bf16.msra.mxu0 %v3372_v51  ;;  %4053 = vst [vmem:[#allocation13_spill] sm:$0xff] %v3383_v54  ;;  %v3388_v56 = vld [vmem:[%s3089_s27 + $0x220] ss:$8 sps:$4 sm:$0xff]  }
 0x14d   : > { %v850_v3 = vadd.f32 %v849_v61, %v848_v53  ;;  %v957_v4 = vrot.slane %v956_v63, 4  ;;  %v3380_v53 = vld [vmem:[%s3089_s27 + $0x210] ss:$8 sps:$4 sm:$0xff]   ;;  %1922 = vmatprep.subr.bf16.mxu0 %v3383_v54  ;;  %4054 = vst [vmem:[#allocation14_spill] sm:$0xff] %v3388_v56 }
 0x14e   : > { %v838_v6 = vrot.slane %v837_v0, 2  ;;  %v945_v7 = vadd.f32 %v944_v1, %v943_v57  ;;  %4052 = vst [vmem:[#allocation12_spill] sm:$0xff] %v3380_v53  ;;  %v3391_v57 = vld [vmem:[%s3089_s27 + $0x224] ss:$8 sps:$4 sm:$0xff]  }
 0x14f   : > { %v851_v10 = vrot.slane %v850_v3, 2  ;;  %v958_v11 = vadd.f32 %v957_v4, %v956_v63  ;;  %4055 = vst [vmem:[#allocation15_spill] sm:$0xff] %v3391_v57  ;;  %v4025_v63 = vmov 0  }
 0x150   : > { %v839_v12 = vadd.f32 %v838_v6, %v837_v0  ;;  %v946_v13 = vrot.slane %v945_v7, 2  ;;  %1923 = vmatpush1.bf16.msra.mxu0 %v3380_v53  ;;  %1952 = vmatprep.mubr.bf16.mxu0 %v4025_v63 }
 0x151   : > { %v852_v15 = vadd.f32 %v851_v10, %v850_v3  ;;  %v959_v17 = vrot.slane %v958_v11, 2  ;;  %1924 = vmatprep.subr.bf16.mxu0 %v3391_v57 }
 0x152   : > { %v840_v18 = vrot.slane %v839_v12, 1  ;;  %v947_v16 = vadd.f32 %v946_v13, %v945_v7 }
 0x153   : > { %v853_v21 = vrot.slane %v852_v15, 1  ;;  %v960_v23 = vadd.f32 %v959_v17, %v958_v11 }
 0x154   : > { %v841_v24 = vadd.f32 %v840_v18, %v839_v12  ;;  %v948_v25 = vrot.slane %v947_v16, 1  ;;  %1925 = vmatpush1.bf16.msra.mxu0 %v3388_v56 }
 0x155   : > { %v854_v27 = vadd.f32 %v853_v21, %v852_v15  ;;  %v961_v28 = vrot.slane %v960_v23, 1 }
 0x156   : > { %v949_v29 = vadd.f32 %v948_v25, %v947_v16  ;;  %v3363_v30 = vmul.f32 0.020408163, %v841_v24 }
 0x157   : > { %v962_v31 = vadd.f32 %v961_v28, %v960_v23  ;;  %v3365_v32 = vmul.f32 0.020408163, %v854_v27 }
 0x158   : > { %v1013_v33 = vmul.f32 0.020408163, %v949_v29  ;;  %v1018_v36 = vmul.f32 %v3363_v30, %v3363_v30 }
 0x159   : > { %v1014_v39 = vmul.f32 0.020408163, %v962_v31  ;;  %v1019_v44 = vmul.f32 %v3365_v32, %v3365_v32 }
 0x15a   : > { %v1023_v45 = vsub.f32 %v1013_v33, %v1018_v36 }
 0x15b   : > { %v1024_v48 = vsub.f32 %v1014_v39, %v1019_v44 }
 0x15c   : > { %v1030_v49 = vadd.f32 1e-05, %v1023_v45 }
 0x15d   : > { %v1031_v50 = vadd.f32 1e-05, %v1024_v48 }
 0x15e   : > { %3019 = vrsqrt.f32 %v1030_v49 }
 0x15f   : > { %3021 = vrsqrt.f32 %v1031_v50 }
 0x168   : > { %v3394_v58 = vpop.eup %3019 }
 0x169   : > { %v3397_v60 = vpop.eup %3021 }
 0x16e   : > { %v3402_v0 = vpop.f32.mrb[16].mxu0 }
 0x16f   : > { %v3404_v1 = vpop.f32.mrb[17].mxu0  ;;  %v904_v4 = vmul.f32 %v3402_v0, %v3402_v0 }
 0x170   : > { %v3406_v3 = vpop.f32.mrb[18].mxu0  ;;  %v905_v11 = vmul.f32 %v3404_v1, %v3404_v1 }
 0x171   : > { %v855_v6 = vadd.f32 %v3406_v3, %v3402_v0  ;;  %v909_v7 = vmul.f32 %v3406_v3, %v3406_v3  ;;  %v3414_v10 = vpop.f32.mrb[19].mxu0 }
 0x172   : > { %v868_v12 = vadd.f32 %v3414_v10, %v3404_v1  ;;  %v910_v13 = vmul.f32 %v3414_v10, %v3414_v10 }
 0x173   : > { %v963_v15 = vadd.f32 %v909_v7, %v904_v4 }
 0x174   : > { %v976_v17 = vadd.f32 %v910_v13, %v905_v11 }
 0x176   : > { %v3422_v18 = vpop.f32.mrb[20].mxu0 }
 0x177   : > { %v856_v16 = vadd.f32 %v855_v6, %v3422_v18  ;;  %v914_v21 = vmul.f32 %v3422_v18, %v3422_v18  ;;  %v3427_v23 = vpop.f32.mrb[21].mxu0 }
 0x178   : > { %v869_v24 = vadd.f32 %v868_v12, %v3427_v23  ;;  %v915_v25 = vmul.f32 %v3427_v23, %v3427_v23  ;;  %v3432_v27 = vpop.f32.mrb[22].mxu0 }
 0x179   : > { %v964_v28 = vadd.f32 %v963_v15, %v914_v21  ;;  %v857_v29 = vadd.f32 %v856_v16, %v3432_v27  ;;  %v919_v31 = vmul.f32 %v3432_v27, %v3432_v27  ;;  %v3437_v33 = vpop.f32.mrb[23].mxu0 }
 0x17a   : > { %v977_v36 = vadd.f32 %v976_v17, %v915_v25  ;;  %v870_v39 = vadd.f32 %v869_v24, %v3437_v33  ;;  %v920_v44 = vmul.f32 %v3437_v33, %v3437_v33 }
 0x17b   : > { %v965_v45 = vadd.f32 %v964_v28, %v919_v31 }
 0x17c   : > { %v978_v48 = vadd.f32 %v977_v36, %v920_v44 }
 0x17e   : > { %v3442_v49 = vpop.f32.mrb[24].mxu0 }
 0x17f   : > { %v858_v50 = vadd.f32 %v857_v29, %v3442_v49  ;;  %v924_v4 = vmul.f32 %v3442_v49, %v3442_v49  ;;  %v3447_v6 = vpop.f32.mrb[25].mxu0 }
 0x180   : > { %v871_v7 = vadd.f32 %v870_v39, %v3447_v6  ;;  %v925_v11 = vmul.f32 %v3447_v6, %v3447_v6  ;;  %v3452_v12 = vpop.f32.mrb[26].mxu0 }
 0x181   : > { %v966_v13 = vadd.f32 %v965_v45, %v924_v4  ;;  %v859_v15 = vadd.f32 %v858_v50, %v3452_v12  ;;  %v929_v17 = vmul.f32 %v3452_v12, %v3452_v12  ;;  %v3457_v16 = vpop.f32.mrb[27].mxu0 }
 0x182   : > { %v979_v21 = vadd.f32 %v978_v48, %v925_v11  ;;  %v872_v24 = vadd.f32 %v871_v7, %v3457_v16  ;;  %v930_v25 = vmul.f32 %v3457_v16, %v3457_v16 }
 0x183   : > { %v967_v28 = vadd.f32 %v966_v13, %v929_v17 }
 0x184   : > { %v980_v29 = vadd.f32 %v979_v21, %v930_v25 }
 0x186   : > { %v3462_v31 = vpop.f32.mrb[28].mxu0 }
 0x187   : > { %v860_v36 = vsel %vm833_vm10, %v3462_v31, 0.0  ;;  %v934_v39 = vmul.f32 %v3462_v31, %v3462_v31  ;;  %v3468_v44 = vpop.f32.mrb[29].mxu0 }
 0x188   : > { %v861_v45 = vadd.f32 %v860_v36, %v859_v15  ;;  %v873_v48 = vsel %vm833_vm10, %v3468_v44, 0.0  ;;  %v935_v50 = vmul.f32 %v3468_v44, %v3468_v44  ;;  %v761_v4 = vpop.f32.mrb[30].mxu0 }
 0x189   : > { %v968_v7 = vsel %vm833_vm10, %v934_v39, 0.0  ;;  %v874_v11 = vadd.f32 %v873_v48, %v872_v24  ;;  %v762_v13 = vpop.f32.mrb[31].mxu0 }
 0x18a   : > { %v862_v17 = vrot.slane %v861_v45, 4  ;;  %v969_v21 = vadd.f32 %v968_v7, %v967_v28  ;;  %v981_v25 = vsel %vm833_vm10, %v935_v50, 0.0 }
 0x18b   : > { %v875_v63 = vrot.slane %v874_v11, 4  ;;  %v982_v61 = vadd.f32 %v981_v25, %v980_v29 }
 0x18c   : > { %v863_v20 = vadd.f32 %v862_v17, %v861_v45  ;;  %v970_v42 = vrot.slane %v969_v21, 4 }
 0x18d   : > { %v876_v15 = vadd.f32 %v875_v63, %v874_v11  ;;  %v983_v36 = vrot.slane %v982_v61, 4 }
 0x18e   : > { %v864_v41 = vrot.slane %v863_v20, 2  ;;  %v971_v35 = vadd.f32 %v970_v42, %v969_v21  ;;  %v3476_v34 = vpop.f32.mrb[32].mxu0 }
 0x18f   : > { %v877_v4 = vrot.slane %v876_v15, 2  ;;  %v984_v8 = vadd.f32 %v983_v36, %v982_v61  ;;  %v3478_v39 = vpop.f32.mrb[33].mxu0  ;;  %v916_v28 = vmul.f32 %v3476_v34, %v3476_v34  ;;  %v885_v42 = vsel %vm881_vm11, %v3476_v34, 0.0 }
 0x190   : > { %v865_v24 = vadd.f32 %v864_v41, %v863_v20  ;;  %v972_v48 = vrot.slane %v971_v35, 2  ;;  %v906_v29 = vmul.f32 %v3478_v39, %v3478_v39  ;;  %v3484_v45 = vpop.f32.mrb[34].mxu0  ;;  %v882_v61 = vsel %vm881_vm11, %v3478_v39, 0.0 }
 0x191   : > { %v878_v63 = vadd.f32 %v877_v4, %v876_v15  ;;  %v985_v50 = vrot.slane %v984_v8, 2  ;;  %v3490_v7 = vpop.f32.mrb[35].mxu0  ;;  %v921_v13 = vmul.f32 %v3484_v45, %v3484_v45  ;;  %v992_v9 = vsel %vm881_vm11, %v916_v28, 0.0 }
 0x192   : > { %v866_v20 = vrot.slane %v865_v24, 1  ;;  %v973_v41 = vadd.f32 %v972_v48, %v971_v35  ;;  %v989_v11 = vsel %vm881_vm11, %v906_v29, 0.0  ;;  %v883_v25 = vsel %vm881_vm11, %v3490_v7, 0.0 }
 0x193   : > { %v879_v17 = vrot.slane %v878_v63, 1  ;;  %v986_v21 = vadd.f32 %v985_v50, %v984_v8  ;;  %v911_v15 = vmul.f32 %v3490_v7, %v3490_v7  ;;  %v884_v56 = vadd.f32 %v883_v25, %v882_v61 }
 0x194   : > { %v867_v36 = vadd.f32 %v866_v20, %v865_v24  ;;  %v974_v4 = vrot.slane %v973_v41, 1  ;;  %v887_v48 = vsel %vm881_vm11, %v3484_v45, 0.0  ;;  %v994_v28 = vsel %vm881_vm11, %v921_v13, 0.0 }
 0x195   : > { %v880_v57 = vadd.f32 %v879_v17, %v878_v63  ;;  %v987_v35 = vrot.slane %v986_v21, 1  ;;  %v990_v29 = vsel %vm881_vm11, %v911_v15, 0.0  ;;  %v886_v50 = vadd.f32 %v885_v42, %v884_v56 }
 0x196   : > { %v975_v53 = vadd.f32 %v974_v4, %v973_v41  ;;  %v3503_v8 = vmul.f32 0.020408163, %v867_v36  ;;  %v991_v54 = vadd.f32 %v990_v29, %v989_v11  ;;  %v3505_v51 = vpop.f32.mrb[36].mxu0 }
 0x197   : > { %4056 = vst [vmem:[#allocation16_spill] sm:$0xff] %v3505_v51  ;;  %v988_v52 = vadd.f32 %v987_v35, %v986_v21  ;;  %v3507_v24 = vmul.f32 0.020408163, %v880_v57  ;;  %v3510_v63 = vpop.f32.mrb[37].mxu0  ;;  %v888_v41 = vadd.f32 %v887_v48, %v886_v50  ;;  %v936_v57 = vmul.f32 %v3505_v51, %v3505_v51 }
 0x198   : > { %4057 = vst [vmem:[#allocation17_spill] sm:$0xff] %v3510_v63  ;;  %v1015_v61 = vmul.f32 0.020408163, %v975_v53  ;;  %v1020_v20 = vmul.f32 %v3503_v8, %v3503_v8  ;;  %v993_v17 = vadd.f32 %v992_v9, %v991_v54  ;;  %v2791_v25 = vpop.f32.mrb[38].mxu0  ;;  %v889_v42 = vsel %vm881_vm11, %v3510_v63, 0.0 }
 0x199   : > { %v1016_v15 = vmul.f32 0.020408163, %v988_v52  ;;  %v1021_v56 = vmul.f32 %v3507_v24, %v3507_v24  ;;  %v3520_v11 = vpop.f32.mrb[39].mxu0  ;;  %v890_v53 = vadd.f32 %v889_v42, %v888_v41  ;;  %v926_v21 = vmul.f32 %v3510_v63, %v3510_v63 }
 0x19a   : > { %v1025_v13 = vsub.f32 %v1015_v61, %v1020_v20  ;;  %v995_v9 = vadd.f32 %v994_v28, %v993_v17  ;;  %v894_v52 = vsel %vm893_vm12, %v3505_v51, 0.0  ;;  %v891_v36 = vsel %vm881_vm11, %v3520_v11, 0.0 }
 0x19b   : > { %v1026_v54 = vsub.f32 %v1016_v15, %v1021_v56  ;;  %v931_v4 = vmul.f32 %v3520_v11, %v3520_v11  ;;  %v996_v48 = vsel %vm881_vm11, %v926_v21, 0.0  ;;  %v892_v29 = vadd.f32 %v891_v36, %v890_v53 }
 0x19c   : > { %v1032_v35 = vadd.f32 1e-05, %v1025_v13  ;;  %v997_v61 = vadd.f32 %v996_v48, %v995_v9  ;;  %v1000_v28 = vsel %vm893_vm12, %v936_v57, 0.0  ;;  %v3040_v25 = vmov 1983009808  }
 0x19d   : > { %v1033_v50 = vadd.f32 1e-05, %v1026_v54  ;;  %v998_v20 = vsel %vm881_vm11, %v931_v4, 0.0  ;;  %v895_v17 = vadd.f32 %v894_v52, %v892_v29  ;;  %v1048_v15 = vunpack.c.l.s4 %v3040_v25 }
 0x19e   : > { %3023 = vrsqrt.f32 %v1032_v35  ;;  %v999_v41 = vadd.f32 %v998_v20, %v997_v61  ;;  %v4058_v61 = vcombine.low %v3394_v58, %v3397_v60 }
 0x19f   : > { %3025 = vrsqrt.f32 %v1033_v50  ;;  %v896_v56 = vrot.slane %v895_v17, 4  ;;  %v1049_v13 = vunpack.c.0.s8 %v1048_v15 }
 0x1a0   : > { %v1001_v42 = vadd.f32 %v1000_v28, %v999_v41  ;;  %v1081_v41 = vsub.s32 2, %v3096_v5 }
 0x1a1   : > { %v897_v51 = vadd.f32 %v896_v56, %v895_v17  ;;  %v3534_v4 = vsub.s32 %v1049_v13, %v3096_v5  ;;  %v3545_v17 = vsub.s32 0, %v3096_v5  ;;  %v1085_v56 = vsub.s32 4, %v3096_v5 }
 0x1a2   : > { %v1002_v63 = vrot.slane %v1001_v42, 4 }
 0x1a3   : > { %v898_v21 = vrot.slane %v897_v51, 2  ;;  %v1053_v20 = vrot.slane %v4058_v61, %v3534_v4 }
 0x1a4   : > { %v1003_v53 = vadd.f32 %v1002_v63, %v1001_v42  ;;  %v1089_v42 = vsub.s32 6, %v3096_v5 }
 0x1a5   : > { %v899_v54 = vadd.f32 %v898_v21, %v897_v51  ;;  %v1028_v51 = vld [vmem:[%s3079_s19] sm:$0xff] }
 0x1a6   : > { %v1004_v9 = vrot.slane %v1003_v53, 2 }
 0x1a7   : > { %v900_v57 = vrot.slane %v899_v54, 1 }
 0x1a8   : > { %v3024_v36 = vpop.eup %3023  ;;  %v1005_v35 = vadd.f32 %v1004_v9, %v1003_v53 }
 0x1a9   : > { %v3026_v52 = vpop.eup %3025  ;;  %v901_v29 = vadd.f32 %v900_v57, %v899_v54  ;;  %v3554_v57 = vsub.s32 1, %v3096_v5 }
 0x1aa   : > { %v1046_v48 = vcombine.low %v3024_v36, %v3026_v52  ;;  %v1006_v50 = vrot.slane %v1005_v35, 1  ;;  %v1207_v52 = vsub.s32 5, %v3096_v5 }
 0x1ab   : > { %v3541_v63 = vmul.f32 0.020408163, %v901_v29 }
 0x1ac   : > { %v1060_v28 = vrot.slane %v1046_v48, %v3534_v4  ;;  %v1007_v25 = vadd.f32 %v1006_v50, %v1005_v35  ;;  %v1211_v35 = vsub.s32 7, %v3096_v5 }
 0x1ad   : > { %v1022_v58 = vmul.f32 %v3541_v63, %v3541_v63 }
 0x1ae   : > { %v1061_v15 = vcombine.low %v1053_v20, %v1060_v28  ;;  %v1017_v60 = vmul.f32 0.020408163, %v1007_v25 }
 0x1b0   : > { %v1071_v13 = vmul.f32 %v1061_v15, %v1028_v51  ;;  %v1027_v21 = vsub.f32 %v1017_v60, %v1022_v58  ;;  %v1203_v58 = vsub.s32 3, %v3096_v5 }
 0x1b2   : > { %v1078_v53 = vrot.slane %v1071_v13, %v3545_v17  ;;  %v1082_v54 = vrot.slane %v1071_v13, %v1081_v41  ;;  %v1086_v9 = vrot.slane %v1071_v13, %v1085_v56  ;;  %v1090_v36 = vrot.slane %v1071_v13, %v1089_v42 }
 0x1b3   : > { %v1034_v48 = vadd.f32 1e-05, %v1027_v21 }
 0x1b4   : > { %v1100_v29 = vmul.f32 %v1078_v53, %v3363_v30  ;;  %v1101_v50 = vmul.f32 %v1082_v54, %v3365_v32  ;;  %v1102_v61 = vmul.f32 %v1086_v9, %v3503_v8  ;;  %v1103_v20 = vmul.f32 %v1090_v36, %v3507_v24 }
 0x1b5   : > { %v1143_v28 = vrot.slane %v1078_v53, %v3545_v17  ;;  %v1151_v41 = vrot.slane %v1086_v9, %v3545_v17  ;;  %v1155_v25 = vrot.slane %v1090_v36, %v3545_v17  ;;  %3027 = vrsqrt.f32 %v1034_v48 }
 0x1b6   : > { %v1110_v15 = vcombine.low %v1100_v29, %v1101_v50  ;;  %v1111_v56 = vcombine.low %v1102_v61, %v1103_v20  ;;  %v1147_v42 = vrot.slane %v1082_v54, %v3545_v17 }
 0x1b7   : > { %v3568_v30 = vmul.f32 %v1155_v25, %v3468_v44  ;;  %v1160_v32 = vmul.f32 %v1143_v28, %v3275_v37  ;;  %v1165_v8 = vmul.f32 %v1143_v28, %v3282_v43  ;;  %v1170_v24 = vmul.f32 %v1143_v28, %v3299_v55 }
 0x1b8   : > { %v1118_v60 = vrot.slane %v1110_v15, %v3534_v4  ;;  %v1125_v13 = vrot.slane %v1111_v56, %v3534_v4  ;;  %v1161_v21 = vmul.f32 %v1147_v42, %v3280_v40  ;;  %v1166_v53 = vmul.f32 %v1147_v42, %v3288_v46 }
 0x1b9   : > { %v1171_v54 = vmul.f32 %v1147_v42, %v3305_v59  ;;  %v1176_v9 = vmul.f32 %v1147_v42, %v3315_v2  ;;  %v1175_v44 = vmul.f32 %v1143_v28, %v3310_v62  ;;  %v1181_v37 = vmul.f32 %v1147_v42, %v3329_v19 }
 0x1ba   : > { %v1126_v36 = vcombine.low %v1118_v60, %v1125_v13  ;;  %v1186_v43 = vmul.f32 %v1147_v42, %v3339_v26  ;;  %v1180_v55 = vmul.f32 %v1143_v28, %v3323_v14  ;;  %v1185_v48 = vmul.f32 %v1143_v28, %v3334_v22 }
 0x1bb   : > { %v1191_v29 = vmul.f32 %v1147_v42, %v3354_v47  ;;  %v1190_v40 = vmul.f32 %v1143_v28, %v3347_v38  ;;  %v3587_v46 = vmul.f32 %v1155_v25, %v3404_v1  ;;  %v3590_v59 = vmul.f32 %v1155_v25, %v3414_v10 }
 0x1bc   : > { %v1134_v62 = vrot.slane %v1126_v36, 7  ;;  %v3593_v2 = vmul.f32 %v1151_v41, %v3402_v0  ;;  %v3596_v19 = vmul.f32 %v1151_v41, %v3406_v3  ;;  %v3599_v14 = vmul.f32 %v1155_v25, %v3427_v23 }
 0x1bd   : > { %v3602_v22 = vmul.f32 %v1155_v25, %v3437_v33  ;;  %v3605_v26 = vmul.f32 %v1151_v41, %v3422_v18  ;;  %v3608_v38 = vmul.f32 %v1151_v41, %v3432_v27  ;;  %v3611_v47 = vmul.f32 %v1155_v25, %v3447_v6  ;;  %v1029_v33 = vld [vmem:[%s3079_s19 + $0x8] sm:$0x3] }
 0x1be   : > { %v1138_v0 = vsub.f32 %v1028_v51, %v1134_v62  ;;  %v3614_v1 = vmul.f32 %v1155_v25, %v3457_v16  ;;  %v3617_v3 = vmul.f32 %v1151_v41, %v3442_v49  ;;  %v3620_v10 = vmul.f32 %v1151_v41, %v3452_v12 }
 0x1bf   : > { %v3028_v23 = vpop.eup %3027  ;;  %v3624_v18 = vmul.f32 %v1151_v41, %v3462_v31 }
 0x1c0   : > { %v1200_v27 = vrot.slane %v1138_v0, %v3554_v57  ;;  %v1208_v50 = vrot.slane %v1138_v0, %v1207_v52  ;;  %v1212_v6 = vrot.slane %v1138_v0, %v1211_v35  ;;  %v1068_v51 = vrot.slane %v3028_v23, %v3534_v4 }
 0x1c1   : > { %v1204_v61 = vrot.slane %v1138_v0, %v1203_v58 }
 0x1c2   : > { %v3629_v16 = vrot.slane %v1208_v50, %v3554_v57  ;;  %v1072_v49 = vmul.f32 %v1068_v51, %v1029_v33  ;;  %v1225_v20 = vrot.slane %v1200_v27, %v3554_v57  ;;  %v3634_v28 = vrot.slane %v1212_v6, %v3554_v57  ;;  %v2967_v6 = vld [vmem:[%s3089_s27 + $0x114] ss:$8 sps:$4 sm:$0xff]  }
 0x1c3   : > { %v1229_v12 = vrot.slane %v1204_v61, %v3554_v57 }
 0x1c4   : > { %v1094_v31 = vrot.slane %v1072_v49, %v3545_v17  ;;  %v1242_v41 = vadd.f32 %v1225_v20, %v1160_v32  ;;  %v1247_v25 = vadd.f32 %v1225_v20, %v1165_v8  ;;  %v1252_v52 = vadd.f32 %v1225_v20, %v1170_v24 }
 0x1c5   : > { %v1243_v35 = vadd.f32 %v1229_v12, %v1161_v21  ;;  %v1248_v15 = vadd.f32 %v1229_v12, %v1166_v53  ;;  %v1253_v56 = vadd.f32 %v1229_v12, %v1171_v54  ;;  %v1258_v42 = vadd.f32 %v1229_v12, %v1176_v9  ;;  %v2962_v54 = vld [vmem:[%s3089_s27 + $0x100] ss:$8 sps:$4 sm:$0xff]  }
 0x1c6   : > { %v1104_v58 = vmul.f32 %v1094_v31, %v3541_v63  ;;  %v3639_v60 = vrot.slane %v1094_v31, %v3545_v17  ;;  %v1277_v13 = vmax.f32 %v1242_v41, 0.0  ;;  %v1282_v36 = vmax.f32 %v1247_v25, 0.0 }
 0x1c7   : > { %v1278_v62 = vmax.f32 %v1243_v35, 0.0  ;;  %v1283_v0 = vmax.f32 %v1248_v15, 0.0  ;;  %v1288_v23 = vmax.f32 %v1253_v56, 0.0  ;;  %v1293_v27 = vmax.f32 %v1258_v42, 0.0 }
 0x1c8   : > { %v1133_v32 = vrot.slane %v1104_v58, %v3534_v4  ;;  %v1189_v8 = vmul.f32 %v3639_v60, %v3520_v11  ;;  %v1312_v24 = vpack.c.bf16 %v1282_v36, %v1277_v13  ;;  %v1257_v21 = vadd.f32 %v1225_v20, %v1175_v44  ;;  %v2968_v13 = vld [vmem:[%s3089_s27 + $0x120] ss:$8 sps:$4 sm:$0xff]  }
 0x1c9   : > { %v1313_v53 = vpack.c.bf16 %v1283_v0, %v1278_v62  ;;  %v1318_v63 = vpack.c.bf16 %v1293_v27, %v1288_v23  ;;  %v1287_v9 = vmax.f32 %v1252_v52, 0.0  ;;  %v1263_v17 = vadd.f32 %v1229_v12, %v1181_v37  ;;  %v2965_v37 = vld [vmem:[%s3089_s27 + $0x110] ss:$8 sps:$4 sm:$0xff]  }
 0x1ca   : > { %v1135_v50 = vrot.slane %v1133_v32, 7  ;;  %v1292_v51 = vmax.f32 %v1257_v21, 0.0  ;;  %v1268_v61 = vadd.f32 %v1229_v12, %v1186_v43  ;;  %v1262_v49 = vadd.f32 %v1225_v20, %v1180_v55  ;;  %v2971_v21 = vld [vmem:[%s3089_s27 + $0x130] ss:$8 sps:$4 sm:$0xff]  }
 0x1cb   : > { %1810 = vmatprep.mubr.bf16.mxu1 %v1313_v53  ;;  %v1298_v31 = vmax.f32 %v1263_v17, 0.0  ;;  %v1267_v4 = vadd.f32 %v1225_v20, %v1185_v48  ;;  %v3646_v41 = vadd.f32 %v1229_v12, %v1191_v29  ;;  %v3648_v11 = vadd.f32 %v1225_v20, %v1190_v40  ;;  %v2970_v48 = vld [vmem:[%s3089_s27 + $0x124] ss:$8 sps:$4 sm:$0xff]  }
 0x1cc   : > { %v1139_v44 = vsub.f32 %v1029_v33, %v1135_v50  ;;  %1811 = vmatmul.mubr.bf16.vlgmr.msra.gmra.mrb[0].mxu1 %v1312_v24  ;;  %v1317_v25 = vpack.c.bf16 %v1292_v51, %v1287_v9  ;;  %v1303_v35 = vmax.f32 %v1268_v61, 0.0  ;;  %v1297_v52 = vmax.f32 %v1262_v49, 0.0  ;;  %v2976_v17 = vld [vmem:[%s3089_s27 + $0x144] ss:$8 sps:$4 sm:$0xff]  }
 0x1cd   : > { %1850 = vmatpush1.bf16.msra.mxu1 %v2962_v54  ;;  %1820 = vmatprep.mubr.bf16.mxu1 %v1318_v63  ;;  %v1302_v15 = vmax.f32 %v1267_v4, 0.0  ;;  %v1245_v43 = vadd.f32 %v3634_v28, %v3587_v46  ;;  %v1250_v40 = vadd.f32 %v3634_v28, %v3590_v59  ;;  %v1164_v33 = vmul.f32 %v3639_v60, %v3478_v39 }
 0x1ce   : > { %v1216_v55 = vrot.slane %v1139_v44, %v3554_v57  ;;  %1851 = vmatprep.subr.bf16.mxu1 %v2967_v6  ;;  %v1323_v29 = vpack.c.bf16 %v1303_v35, %v1298_v31  ;;  %v1169_v46 = vmul.f32 %v3639_v60, %v3490_v7  ;;  %v1244_v58 = vadd.f32 %v3629_v16, %v3593_v2  ;;  %v2973_v7 = vld [vmem:[%s3089_s27 + $0x134] ss:$8 sps:$4 sm:$0xff]   ;;  %v2974_v44 = vld [vmem:[%s3089_s27 + $0x140] ss:$8 sps:$4 sm:$0xff]  }
 0x1cf   : > { %v1322_v20 = vpack.c.bf16 %v1302_v15, %v1297_v52  ;;  %v1280_v12 = vmax.f32 %v1245_v43, 0.0  ;;  %v1285_v42 = vmax.f32 %v1250_v40, 0.0  ;;  %v1249_v59 = vadd.f32 %v3629_v16, %v3596_v19  ;;  %v4060_v52 = vld [vmem:[#allocation16_spill] sm:$0xff] }
 0x1d0   : > { %v3660_v56 = vrot.slane %v1216_v55, %v3554_v57  ;;  %v1255_v39 = vadd.f32 %v3634_v28, %v3599_v14  ;;  %v1260_v36 = vadd.f32 %v3634_v28, %v3602_v22  ;;  %v1254_v57 = vadd.f32 %v3629_v16, %v3605_v26  ;;  %v2980_v40 = vld [vmem:[%s3089_s27 + $0x150] ss:$8 sps:$4 sm:$0xff]  }
 0x1d1   : > { %1852 = vmatpush1.bf16.msra.mxu1 %v2965_v37  ;;  %v3679_v2 = vpack.c.bf16 %v1285_v42, %v1280_v12  ;;  %v1279_v23 = vmax.f32 %v1244_v58, 0.0  ;;  %v1284_v14 = vmax.f32 %v1249_v59, 0.0  ;;  %v1308_v26 = vmax.f32 %v3646_v41, 0.0  ;;  %v2997_v59 = vld [vmem:[%s3089_s27 + $0x184] ss:$8 sps:$4 sm:$0xff]  }
 0x1d2   : > { %v3676_v62 = vadd.f32 %v3660_v56, %v1189_v8  ;;  %1853 = vmatprep.subr.bf16.mxu1 %v2970_v48  ;;  %v1246_v0 = vadd.f32 %v3660_v56, %v1164_v33  ;;  %v1251_v19 = vadd.f32 %v3660_v56, %v1169_v46  ;;  %v1290_v27 = vmax.f32 %v1255_v39, 0.0  ;;  %v2988_v33 = vld [vmem:[%s3089_s27 + $0x164] ss:$8 sps:$4 sm:$0xff]   ;;  %v2995_v39 = vld [vmem:[%s3089_s27 + $0x180] ss:$8 sps:$4 sm:$0xff]  }
 0x1d3   : > { %v1295_v22 = vmax.f32 %v1260_v36, 0.0  ;;  %v1259_v24 = vadd.f32 %v3629_v16, %v3608_v38  ;;  %v3687_v53 = vpack.c.bf16 %v1284_v14, %v1279_v23  ;;  %v1289_v63 = vmax.f32 %v1254_v57, 0.0  ;;  %v3000_v36 = vld [vmem:[%s3089_s27 + $0x194] ss:$8 sps:$4 sm:$0xff]   ;;  %v2998_v57 = vld [vmem:[%s3089_s27 + $0x190] ss:$8 sps:$4 sm:$0xff]  }
 0x1d4   : > { %1821 = vmatmul.mubr.bf16.gmra.mrb[4].mxu1 %v1317_v25  ;;  %v1281_v32 = vmax.f32 %v1246_v0, 0.0  ;;  %v1286_v8 = vmax.f32 %v1251_v19, 0.0  ;;  %v1265_v9 = vadd.f32 %v3634_v28, %v3611_v47  ;;  %v1270_v51 = vadd.f32 %v3634_v28, %v3614_v1  ;;  %v4059_v25 = vld [vmem:[#allocation17_spill] sm:$0xff]  ;;  %v3004_v0 = vld [vmem:[%s3089_s27 + $0x1b0] ss:$8 sps:$4 sm:$0xff]  }
 0x1d5   : > { %1854 = vmatpush1.bf16.msra.mxu1 %v2968_v13  ;;  %1830 = vmatprep.mubr.bf16.mxu1 %v1323_v29  ;;  %v3689_v54 = vpack.c.bf16 %v1295_v22, %v1290_v27  ;;  %v1294_v6 = vmax.f32 %v1259_v24, 0.0  ;;  %v1264_v38 = vadd.f32 %v3629_v16, %v3617_v3  ;;  %v1269_v49 = vadd.f32 %v3629_v16, %v3620_v10  ;;  %v2994_v13 = vld [vmem:[%s3089_s27 + $0x174] ss:$8 sps:$4 sm:$0xff]   ;;  %v3009_v19 = vld [vmem:[%s3089_s27 + $0x1c4] ss:$8 sps:$4 sm:$0xff]  }
 0x1d6   : > { %1855 = vmatprep.subr.bf16.mxu1 %v2973_v7  ;;  %v1316_v50 = vpack.c.bf16 %v1286_v8, %v1281_v32  ;;  %v1300_v61 = vmax.f32 %v1265_v9, 0.0  ;;  %v3702_v31 = vadd.f32 %v3634_v28, %v3568_v30  ;;  %v3706_v47 = vadd.f32 %v3629_v16, %v3624_v18  ;;  %v2982_v28 = vld [vmem:[%s3089_s27 + $0x154] ss:$8 sps:$4 sm:$0xff]   ;;  %v3001_v7 = vld [vmem:[%s3089_s27 + $0x1a0] ss:$8 sps:$4 sm:$0xff]  }
 0x1d7   : > { %v3709_v4 = vpack.c.bf16 %v1294_v6, %v1289_v63  ;;  %v1305_v1 = vmax.f32 %v1270_v51, 0.0  ;;  %v1299_v41 = vmax.f32 %v1264_v38, 0.0  ;;  %v1174_v3 = vmul.f32 %v3476_v34, %v3639_v60  ;;  %v3007_v23 = vld [vmem:[%s3089_s27 + $0x1c0] ss:$8 sps:$4 sm:$0xff]   ;;  %v3012_v14 = vld [vmem:[%s3089_s27 + $0x1d4] ss:$8 sps:$4 sm:$0xff]  }
 0x1d8   : > { %2667 = vmatmul.mubr.msk.bf16.vlgmr.msra.gmra.mrb[40].mxu0 %vm881_vm11, %v1316_v50  ;;  %v1304_v10 = vmax.f32 %v1269_v49, 0.0  ;;  %v1179_v30 = vmul.f32 %v3484_v45, %v3639_v60  ;;  %v1184_v35 = vmul.f32 %v3639_v60, %v4059_v25  ;;  %v1194_v34 = vmul.f32 %v4060_v52, %v3639_v60  ;;  %v3010_v27 = vld [vmem:[%s3089_s27 + $0x1d0] ss:$8 sps:$4 sm:$0xff]   ;;  %v3015_v22 = vld [vmem:[%s3089_s27 + $0x1e4] ss:$8 sps:$4 sm:$0xff]  }
 0x1d9   : > { %1856 = vmatpush1.bf16.msra.mxu1 %v2971_v21  ;;  %v3717_v18 = vpack.c.bf16 %v1305_v1, %v1300_v61  ;;  %v1256_v16 = vadd.f32 %v3660_v56, %v1174_v3  ;;  %v1328_v37 = vpack.c.bf16 %v1308_v26, %v1308_v26  ;;  %v1306_v45 = vmax.f32 %v3676_v62, 0.0  ;;  %v3003_v62 = vld [vmem:[%s3089_s27 + $0x1a4] ss:$8 sps:$4 sm:$0xff]   ;;  %v3013_v26 = vld [vmem:[%s3089_s27 + $0x1e0] ss:$8 sps:$4 sm:$0xff]   ;;  %v4061_v24 = vld [vmem:[#allocation11_spill] sm:$0xff] }
 0x1da   : > { %1857 = vmatprep.subr.bf16.mxu1 %v2976_v17  ;;  %v3724_v15 = vpack.c.bf16 %v1304_v10, %v1299_v41  ;;  %v1261_v43 = vadd.f32 %v3660_v56, %v1179_v30  ;;  %v1266_v48 = vadd.f32 %v3660_v56, %v1184_v35  ;;  %v3730_v29 = vadd.f32 %v3660_v56, %v1194_v34  ;;  %v2986_v56 = vld [vmem:[%s3089_s27 + $0x160] ss:$8 sps:$4 sm:$0xff]   ;;  %v3018_v32 = vld [vmem:[%s3089_s27 + $0x1f4] ss:$8 sps:$4 sm:$0xff]   ;;  %v3016_v8 = vld [vmem:[%s3089_s27 + $0x1f0] ss:$8 sps:$4 sm:$0xff]  }
 0x1db   : > { %v1291_v55 = vmax.f32 %v1256_v16, 0.0  ;;  %v1307_v12 = vmax.f32 %v3648_v11, 0.0  ;;  %v2992_v11 = vld [vmem:[%s3089_s27 + $0x170] ss:$8 sps:$4 sm:$0xff]   ;;  %v4062_v21 = vld [vmem:[#allocation10_spill] sm:$0xff]  ;;  %v4063_v63 = vld [vmem:[#allocation13_spill] sm:$0xff] }
 0x1dc   : > { %1831 = vmatmul.mubr.bf16.gmra.mrb[8].mxu1 %v1322_v20  ;;  %v1296_v60 = vmax.f32 %v1261_v43, 0.0  ;;  %v1301_v42 = vmax.f32 %v1266_v48, 0.0  ;;  %v4064_v9 = vld [vmem:[#allocation12_spill] sm:$0xff]  ;;  %v4065_v17 = vld [vmem:[#allocation15_spill] sm:$0xff]  ;;  %v4066_v50 = vld [vmem:[#allocation14_spill] sm:$0xff]  ;;  %v1310_v6 = vmax.f32 %v3702_v31, 0.0 }
 0x1dd   : > { %1858 = vmatpush1.bf16.msra.mxu1 %v2974_v44  ;;  %1840 = vmatprep.mubr.bf16.mxu1 %v1328_v37  ;;  %v1327_v58 = vpack.c.bf16 %v1307_v12, %v1307_v12  ;;  %v4067_v38 = vmov 0   ;;  %v1311_v61 = vmax.f32 %v3730_v29, 0.0  ;;  %v1332_v30 = vld [vmem:[#allocation2] sm:$0xff]  ;;  %v1333_v16 = vld [vmem:[#allocation2 + $0x8] sm:$0xff]  ;;  %v1334_v52 = vld [vmem:[#allocation2 + $0x10] sm:$0xff] }
 0x1de   : > { %1859 = vmatprep.subr.bf16.mxu1 %v2982_v28  ;;  %v3735_v20 = vpack.c.bf16 %v1296_v60, %v1291_v55  ;;  %v3737_v46 = vpack.c.bf16 %v1306_v45, %v1301_v42  ;;  %v1330_v51 = vpack.c.bf16 %v1310_v6, %v1310_v6  ;;  %v1335_v43 = vld [vmem:[#allocation2 + $0x18] sm:$0xff] }
 0x1df   : > { %v1331_v49 = vpack.c.bf16 %v1311_v61, %v1311_v61 }
 0x1e1   : > { %1860 = vmatpush1.bf16.msra.mxu1 %v2980_v40 }
 0x1e2   : > { %1861 = vmatprep.subr.bf16.mxu1 %v2988_v33 }
 0x1e4   : > { %1841 = vmatmul.mubr.bf16.gmra.mrb[12].mxu1 %v1327_v58  ;;  %v1337_v58 = vld [vmem:[#allocation2 + $0x28] sm:$0xff] }
 0x1e5   : > { %1862 = vmatpush1.bf16.msra.mxu1 %v2986_v56  ;;  %1881 = vmatprep.mubr.bf16.mxu1 %v3679_v2  ;;  %v3006_v2 = vld [vmem:[%s3089_s27 + $0x1b4] ss:$8 sps:$4 sm:$0xff]   ;;  %v1336_v56 = vld [vmem:[#allocation2 + $0x20] sm:$0xff] }
 0x1e6   : > { %1863 = vmatprep.subr.bf16.mxu1 %v2994_v13 }
 0x1e9   : > { %1864 = vmatpush1.bf16.msra.mxu1 %v2992_v11  ;;  %v1338_v11 = vld [vmem:[#allocation2 + $0x30] sm:$0xff] }
 0x1ea   : > { %1865 = vmatprep.subr.bf16.mxu1 %v2997_v59 }
 0x1ed   : > { %1866 = vmatpush1.bf16.msra.mxu1 %v2995_v39 }
 0x1ee   : > { %1867 = vmatprep.subr.bf16.mxu1 %v3000_v36  ;;  %v1339_v36 = vld [vmem:[#allocation2 + $0x38] sm:$0xff] }
 0x1f1   : > { %1868 = vmatpush1.bf16.msra.mxu1 %v2998_v57 }
 0x1f2   : > { %1869 = vmatprep.subr.bf16.mxu1 %v3003_v62 }
 0x1f5   : > { %1870 = vmatpush1.bf16.msra.mxu1 %v3001_v7 }
 0x1f6   : > { %1871 = vmatprep.subr.bf16.mxu1 %v3006_v2 }
 0x1f9   : > { %1872 = vmatpush1.bf16.msra.mxu1 %v3004_v0 }
 0x1fa   : > { %1873 = vmatprep.subr.bf16.mxu1 %v3009_v19  ;;  %v1340_v19 = vld [vmem:[#allocation2 + $0x40] sm:$0xff] }
 0x1fd   : > { %1874 = vmatpush1.bf16.msra.mxu1 %v3007_v23  ;;  %v1341_v23 = vld [vmem:[#allocation2 + $0x48] sm:$0xff] }
 0x1fe   : > { %1875 = vmatprep.subr.bf16.mxu1 %v3012_v14 }
 0x201   : > { %1876 = vmatpush1.bf16.msra.mxu1 %v3010_v27  ;;  %v1342_v27 = vld [vmem:[#allocation2 + $0x50] sm:$0xff] }
 0x202   : > { %1877 = vmatprep.subr.bf16.mxu1 %v3015_v22 }
 0x205   : > { %1878 = vmatpush1.bf16.msra.mxu1 %v3013_v26 }
 0x206   : > { %1879 = vmatprep.subr.bf16.mxu1 %v3018_v32  ;;  %v1343_v32 = vld [vmem:[#allocation2 + $0x58] sm:$0xff] }
 0x209   : > { %1880 = vmatpush1.bf16.msra.mxu1 %v3016_v8 }
 0x20a   : > { %2807 = vmatprep.subr.bf16.mxu1 %v4061_v24 }
 0x20c   : > { %1882 = vmatmul.mubr.bf16.vlgmr.msra.gmra.mrb[0].mxu1 %v3687_v53  ;;  %v1309_v53 = vmax.f32 %v3706_v47, 0.0 }
 0x20d   : > { %1891 = vmatprep.mubr.bf16.mxu1 %v3689_v54  ;;  %2810 = vmatpush1.bf16.msra.mxu1 %v4062_v21 }
 0x20e   : > { %2808 = vmatprep.subr.bf16.mxu1 %v4063_v63  ;;  %v1329_v54 = vpack.c.bf16 %v1309_v53, %v1309_v53 }
 0x211   : > { %2811 = vmatpush1.bf16.msra.mxu1 %v4064_v9 }
 0x212   : > { %2809 = vmatprep.subr.bf16.mxu1 %v4065_v17  ;;  %v1344_v17 = vld [vmem:[#allocation2 + $0x60] sm:$0x1] }
 0x214   : > { %1892 = vmatmul.mubr.bf16.gmra.mrb[4].mxu1 %v3709_v4 }
 0x215   : > { %1901 = vmatprep.mubr.bf16.mxu1 %v3717_v18  ;;  %2812 = vmatpush1.bf16.msra.mxu1 %v4066_v50 }
 0x21c   : > { %1902 = vmatmul.mubr.bf16.gmra.mrb[8].mxu1 %v3724_v15 }
 0x21d   : > { %1911 = vmatprep.mubr.bf16.mxu1 %v1330_v51  ;;  %v1345_v51 = vld [vmem:[#allocation2 + $0x68] sm:$0x1] }
 0x224   : > { %1912 = vmatmul.mubr.bf16.gmra.mrb[16].mxu1 %v1329_v54 }
 0x225   : > { %1962 = vmatprep.mubr.bf16.mxu1 %v4067_v38 }
 0x22c   : > { %2668 = vmatmul.mubr.msk.bf16.vlgmr.msra.gmra.mrb[4].mxu1 %vm881_vm11, %v3735_v20 }
 0x22d   : > { %1972 = vmatprep.mubr.bf16.mxu1 %v4067_v38 }
 0x234   : > { %2669 = vmatmul.mubr.msk.bf16.gmra.mrb[8].mxu1 %vm881_vm11, %v3737_v46 }
 0x235   : > { %1982 = vmatprep.mubr.bf16.mxu1 %v4067_v38 }
 0x23c   : > { %2670 = vmatmul.mubr.msk.bf16.gmra.mrb[20].mxu1 %vm881_vm11, %v1331_v49 }
 0x2ab   : > { %v1954_v31 = vpop.f32.mrb[40].mxu0 }
 0x2ac   : > { %v1956_v47 = vpop.f32.mrb[41].mxu0 }
 0x2ad   : > { %v1958_v4 = vpop.f32.mrb[42].mxu0 }
 0x2ae   : > { %v1960_v1 = vpop.f32.mrb[43].mxu0 }
 0x2b7   : > { %v1842_v41 = vpop.f32.mrb[12].mxu1 }
 0x2b8   : > { %v1844_v3 = vpop.f32.mrb[13].mxu1 }
 0x2b9   : > { %v1846_v44 = vpop.f32.mrb[14].mxu1 }
 0x2ba   : > { %v1847_v10 = vpop.f32.mrb[15].mxu1 }
 0x2df   : > { %v1883_v28 = vpop.f32.mrb[0].mxu1 }
 0x2e0   : > { %v2813_v18 = vadd.f32 %v1954_v31, %v1883_v28  ;;  %v1885_v25 = vpop.f32.mrb[1].mxu1 }
 0x2e1   : > { %v2814_v35 = vadd.f32 %v1956_v47, %v1885_v25  ;;  %v1887_v34 = vpop.f32.mrb[2].mxu1 }
 0x2e2   : > { %v1991_v37 = vadd.f32 %v2813_v18, %v1332_v30  ;;  %v2815_v15 = vadd.f32 %v1958_v4, %v1887_v34  ;;  %v1889_v45 = vpop.f32.mrb[3].mxu1  ;;  %v3041_v30 = vmov (!%p2671_p6), 0.0  }
 0x2e3   : > { %v1992_v55 = vadd.f32 %v2814_v35, %v1333_v16  ;;  %v2816_v48 = vadd.f32 %v1960_v1, %v1889_v45  ;;  %2337 = vmatprep.mubr.f32.mxu0 (!%p2671_p6), %v3041_v30  ;;  %2397 = vmatprep.mubr.f32.mxu1 (!%p2671_p6), %v3041_v30 }
 0x2e4   : > { %2005 = vst [vmem:[#allocation2] sm:$0xff] %v1991_v37  ;;  %v1993_v29 = vadd.f32 %v2815_v15, %v1334_v52 }
 0x2e5   : > { %2007 = vst.msk [vmem:[#allocation2 + $0x8] sm:$0xff] %vm2006_vm13, %v1992_v55  ;;  %v1994_v40 = vadd.f32 %v2816_v48, %v1335_v43 }
 0x2e6   : > { %2008 = vst [vmem:[#allocation2 + $0x10] sm:$0xff] %v1993_v29  ;;  %v2044_v29 = vadd.s32 (!%p2671_p6), 96, %v3096_v5 }
 0x2e7   : > { %2009 = vst.msk [vmem:[#allocation2 + $0x18] sm:$0xff] %vm2006_vm13, %v1994_v40 }
 0x2ec   : > { %v2026_v47 = vld [vmem:[#allocation2 + $0x8] sm:$0xff] (!%p2671_p6) }
 0x2ed   : > { %v2027_v44 = vld [vmem:[#allocation2 + $0x10] sm:$0xff] (!%p2671_p6) }
 0x2ee   : > { %v2028_v4 = vld [vmem:[#allocation2 + $0x18] sm:$0xff] (!%p2671_p6) }
 0x2f7   : > { %v1913_v60 = vpop.f32.mrb[16].mxu1 }
 0x2f8   : > { %v1914_v33 = vadd.f32 %v1913_v60, %v1842_v41  ;;  %v1915_v12 = vpop.f32.mrb[17].mxu1  ;;  %v2792_v41 = vpack.c.bf16 (!%p2671_p6), %v2028_v4, %v2026_v47  ;;  %v4070_v60 = vld [vmem:[#allocation4_spill] sm:$0xff] (!%p2671_p6) }
 0x2f9   : > { %v1916_v42 = vadd.f32 %v1915_v12, %v1844_v3  ;;  %v1917_v20 = vpop.f32.mrb[18].mxu1  ;;  %v2025_v3 = vld [vmem:[#allocation2] sm:$0xff] (!%p2671_p6)  ;;  %vm2074_vm0 = vcmp.eq.s32.totalorder (!%p2671_p6), %v2044_v29, %v4070_v60  ;;  %v3042_v12 = vmov (!%p2671_p6), 1.0  }
 0x2fa   : > { %v1918_v46 = vpop.f32.mrb[19].mxu1  ;;  %v2795_v28 = vpack.c.bf16 (!%p2671_p6), %v2027_v44, %v2025_v3  ;;  %2794 = vmatprep.subr.msk.bf16.mxu0 (!%p2671_p6), %vm3790_vm15, %v2792_v41  ;;  %2837 = vmatprep.subr.msk.bf16.mxu1 (!%p2671_p6), %vm3790_vm15, %v2792_v41  ;;  %v2048_v20 = vadd.s32 (!%p2671_p6), 128, %v3096_v5 }
 0x2fb   : > { %v3824_v46 = vadd.s32 (!%p2671_p6), 128, %v4070_v60 }
 0x2fc   : > { %2796 = vmatpush1.bf16.xpose.msra.mxu0 (!%p2671_p6), %v2795_v28  ;;  %2841 = vmatpush1.bf16.xpose.msra.mxu1 (!%p2671_p6), %v2795_v28 }
 0x2fd   : > { %vm2083_vm10 = vcmp.eq.s32.totalorder (!%p2671_p6), %v2048_v20, %v3824_v46 }
 0x2ff   : > { %v1964_v13 = vpop.f32.mrb[4].mxu1 }
 0x300   : > { %v1995_v59 = vadd.f32 %v1964_v13, %v1336_v56  ;;  %v1966_v39 = vpop.f32.mrb[5].mxu1  ;;  %v2049_v13 = vadd.s32 (!%p2671_p6), 136, %v3096_v5 }
 0x301   : > { %v1996_v57 = vadd.f32 %v1966_v39, %v1337_v58  ;;  %v1968_v62 = vpop.f32.mrb[6].mxu1  ;;  %v2047_v58 = vadd.s32 (!%p2671_p6), 120, %v3096_v5  ;;  %v2050_v39 = vadd.s32 (!%p2671_p6), 144, %v3096_v5 }
 0x302   : > { %2010 = vst [vmem:[#allocation2 + $0x20] sm:$0xff] %v1995_v59  ;;  %v1997_v7 = vadd.f32 %v1968_v62, %v1338_v11  ;;  %v1970_v2 = vpop.f32.mrb[7].mxu1  ;;  %v2681_v59 = vsel (!%p2671_p6), %vm2083_vm10, 1.0, %v3041_v30  ;;  %vm2085_vm11 = vcmp.eq.s32.totalorder (!%p2671_p6), %v2049_v13, %v3824_v46  ;;  %v2051_v62 = vadd.s32 (!%p2671_p6), 152, %v3096_v5 }
 0x303   : > { %2011 = vst.msk [vmem:[#allocation2 + $0x28] sm:$0xff] %vm2006_vm13, %v1996_v57  ;;  %v1998_v0 = vadd.f32 %v1970_v2, %v1339_v36  ;;  %v2682_v57 = vsel (!%p2671_p6), %vm2085_vm11, 1.0, %v3041_v30 }
 0x304   : > { %2012 = vst [vmem:[#allocation2 + $0x30] sm:$0xff] %v1997_v7 }
 0x305   : > { %2013 = vst.msk [vmem:[#allocation2 + $0x38] sm:$0xff] %vm2006_vm13, %v1998_v0  ;;  %v2052_v0 = vadd.s32 (!%p2671_p6), 160, %v3096_v5 }
 0x307   : > { %v1974_v14 = vpop.f32.mrb[8].mxu1 }
 0x308   : > { %v1999_v22 = vadd.f32 %v1974_v14, %v1340_v19  ;;  %v1976_v26 = vpop.f32.mrb[9].mxu1 }
 0x309   : > { %v2000_v8 = vadd.f32 %v1976_v26, %v1341_v23  ;;  %v1978_v24 = vpop.f32.mrb[10].mxu1  ;;  %v2029_v25 = vld [vmem:[#allocation2 + $0x20] sm:$0xff] (!%p2671_p6)  ;;  %v2039_v23 = vadd.s32 (!%p2671_p6), 56, %v3096_v5  ;;  %v2040_v26 = vadd.s32 (!%p2671_p6), 64, %v3096_v5 }
 0x30a   : > { %2014 = vst [vmem:[#allocation2 + $0x40] sm:$0xff] %v1999_v22  ;;  %v2001_v21 = vadd.f32 %v1978_v24, %v1342_v27  ;;  %v1980_v63 = vpop.f32.mrb[11].mxu1  ;;  %v2030_v10 = vld [vmem:[#allocation2 + $0x28] sm:$0xff] (!%p2671_p6)  ;;  %v2053_v27 = vadd.s32 (!%p2671_p6), 168, %v3096_v5  ;;  %v2041_v24 = vadd.s32 (!%p2671_p6), 72, %v3096_v5 }
 0x30b   : > { %2015 = vst.msk [vmem:[#allocation2 + $0x48] sm:$0xff] %vm2006_vm13, %v2000_v8  ;;  %v2002_v9 = vadd.f32 %v1980_v63, %v1343_v32  ;;  %v2031_v35 = vld [vmem:[#allocation2 + $0x30] sm:$0xff] (!%p2671_p6)  ;;  %v2054_v8 = vadd.s32 (!%p2671_p6), 176, %v3096_v5  ;;  %v2055_v63 = vadd.s32 (!%p2671_p6), 184, %v3096_v5 }
 0x30c   : > { %2016 = vst [vmem:[#allocation2 + $0x50] sm:$0xff] %v2001_v21  ;;  %v2032_v18 = vld [vmem:[#allocation2 + $0x38] sm:$0xff] (!%p2671_p6)  ;;  %v2800_v37 = vpack.c.bf16 (!%p2671_p6), %v2031_v35, %v2029_v25  ;;  %vm2093_vm12 = vcmp.eq.s32.totalorder (!%p2671_p6), %v2053_v27, %v3824_v46 }
 0x30d   : > { %2017 = vst.msk [vmem:[#allocation2 + $0x58] sm:$0xff] %vm2006_vm13, %v2002_v9  ;;  %v2797_v16 = vpack.c.bf16 (!%p2671_p6), %v2032_v18, %v2030_v10  ;;  %v2686_v21 = vsel (!%p2671_p6), %vm2093_vm12, 1.0, %v3041_v30  ;;  %v2042_v9 = vadd.s32 (!%p2671_p6), 80, %v3096_v5 }
 0x30f   : > { %v1984_v50 = vpop.f32.mrb[20].mxu1  ;;  %2024 = sbr.rel (%p2671_p6) target bundleno = 1060 (0x424), region = 40  ;;  %2799 = vmatprep.subr.msk.bf16.mxu0 (!%p2671_p6), %vm3790_vm15, %v2797_v16  ;;  %2838 = vmatprep.subr.msk.bf16.mxu1 (!%p2671_p6), %vm3790_vm15, %v2797_v16 }
 0x310   : > { %v1985_v6 = vadd.f32 %v1984_v50, %v1914_v33  ;;  %v1986_v53 = vpop.f32.mrb[21].mxu1  ;;  %2801 = vmatpush1.bf16.xpose.msra.mxu0 (!%p2671_p6), %v2800_v37  ;;  %2842 = vmatpush1.bf16.xpose.msra.mxu1 (!%p2671_p6), %v2800_v37  ;;  %v2045_v33 = vadd.s32 (!%p2671_p6), 104, %v3096_v5  ;;  %v2043_v50 = vadd.s32 (!%p2671_p6), 88, %v3096_v5 }
 0x311   : > { %v1987_v54 = vadd.f32 %v1986_v53, %v1916_v42  ;;  %v1988_v38 = vpop.f32.mrb[22].mxu1  ;;  %v2033_v43 = vld [vmem:[#allocation2 + $0x40] sm:$0xff] (!%p2671_p6)  ;;  %v2046_v42 = vadd.s32 (!%p2671_p6), 112, %v3096_v5 }
 0x312   : > { %v2003_v61 = vadd.f32 %v1985_v6, %v1344_v17  ;;  %v1989_v49 = vpop.f32.mrb[23].mxu1  ;;  %v2034_v52 = vld [vmem:[#allocation2 + $0x48] sm:$0xff] (!%p2671_p6)  ;;  %vm2076_vm1 = vcmp.eq.s32.totalorder (!%p2671_p6), %v2045_v33, %v4070_v60 }
 0x313   : > { %v2004_v31 = vadd.f32 %v1987_v54, %v1345_v51  ;;  %v2035_v45 = vld [vmem:[#allocation2 + $0x50] sm:$0xff] (!%p2671_p6) }
 0x314   : > { %2018 = vst [vmem:[#allocation2 + $0x60] sm:$0x1] %v2003_v61  ;;  %v2036_v34 = vld [vmem:[#allocation2 + $0x58] sm:$0xff] (!%p2671_p6)  ;;  %v2805_v55 = vpack.c.bf16 (!%p2671_p6), %v2035_v45, %v2033_v43 }
 0x315   : > { %2020 = vst.msk [vmem:[#allocation2 + $0x68] sm:$0x1] %vm2019_vm14, %v2004_v31  ;;  %v2802_v15 = vpack.c.bf16 (!%p2671_p6), %v2036_v34, %v2034_v52  ;;  %vm2095_vm14 = vcmp.eq.s32.totalorder (!%p2671_p6), %v2054_v8, %v3824_v46 }
 0x316   : > { %v2687_v17 = vsel %vm2095_vm14, 1.0, %v3041_v30 }
 0x317   : > { %2804 = vmatprep.subr.msk.bf16.mxu0 %vm3790_vm15, %v2802_v15  ;;  %2839 = vmatprep.subr.msk.bf16.mxu1 %vm3790_vm15, %v2802_v15  ;;  %vm2068_vm15 = vcmp.eq.s32.totalorder %v2041_v24, %v4070_v60 }
 0x318   : > { %2806 = vmatpush1.bf16.xpose.msra.mxu0 %v2805_v55  ;;  %2843 = vmatpush1.bf16.xpose.msra.mxu1 %v2805_v55 }
 0x31b   : > { %v2037_v40 = vld [vmem:[#allocation2 + $0x60] sm:$0x1] }
 0x31c   : > { %v2038_v48 = vld [vmem:[#allocation2 + $0x68] sm:$0x1] }
 0x31d   : > { %2695 = vmatprep.subr.msk.mxu0 %vm2006_vm13, %v2038_v48  ;;  %2840 = vmatprep.subr.msk.mxu1 %vm2006_vm13, %v2038_v48 }
 0x320   : > { %2286 = vmatpush1.xpose.msra.mxu0 %v2037_v40  ;;  %2844 = vmatpush1.xpose.msra.mxu1 %v2037_v40 }
 0x323   : > { %2696 = vmatmul.mubr.msk.f32.vlgmr.msra.gmra.mrb[0].mxu0 %vm304_vm3, %v3042_v12  ;;  %2708 = vmatmul.mubr.msk.f32.vlgmr.msra.gmra.mrb[0].mxu1 %vm2074_vm0, %v3042_v12  ;;  %vm2078_vm3 = vcmp.eq.s32.totalorder %v2046_v42, %v4070_v60  ;;  %vm2097_vm0 = vcmp.eq.s32.totalorder %v2055_v63, %v3824_v46 }
 0x324   : > { %2342 = vmatprep.mubr.f32.mxu0 %v3041_v30  ;;  %2402 = vmatprep.mubr.f32.mxu1 %v3041_v30  ;;  %v2688_v6 = vsel %vm2097_vm0, 1.0, %v3041_v30 }
 0x327   : > { %2697 = vmatmul.mubr.msk.f32.gmra.mrb[2].mxu0 %vm305_vm4, %v3042_v12  ;;  %2709 = vmatmul.mubr.msk.f32.gmra.mrb[2].mxu1 %vm2076_vm1, %v3042_v12  ;;  %vm2080_vm4 = vcmp.eq.s32.totalorder %v2047_v58, %v4070_v60  ;;  %vm2070_vm1 = vcmp.eq.s32.totalorder %v2042_v9, %v4070_v60 }
 0x328   : > { %2347 = vmatprep.mubr.f32.mxu0 %v3041_v30  ;;  %2407 = vmatprep.mubr.f32.mxu1 %v3041_v30 }
 0x32b   : > { %2698 = vmatmul.mubr.msk.f32.gmra.mrb[4].mxu0 %vm306_vm6, %v3042_v12  ;;  %2710 = vmatmul.mubr.msk.f32.gmra.mrb[4].mxu1 %vm2078_vm3, %v3042_v12  ;;  %vm2087_vm6 = vcmp.eq.s32.totalorder %v2050_v39, %v3824_v46  ;;  %vm2072_vm3 = vcmp.eq.s32.totalorder %v2043_v50, %v4070_v60 }
 0x32c   : > { %2352 = vmatprep.mubr.f32.mxu0 %v3041_v30  ;;  %2412 = vmatprep.mubr.f32.mxu1 %v3041_v30  ;;  %v2683_v2 = vsel %vm2087_vm6, 1.0, %v3041_v30 }
 0x32f   : > { %2699 = vmatmul.mubr.msk.f32.gmra.mrb[6].mxu0 %vm307_vm7, %v3042_v12  ;;  %2711 = vmatmul.mubr.msk.f32.gmra.mrb[6].mxu1 %vm2080_vm4, %v3042_v12  ;;  %vm2089_vm7 = vcmp.eq.s32.totalorder %v2051_v62, %v3824_v46 }
 0x330   : > { %2357 = vmatprep.mubr.f32.mxu0 %v3041_v30  ;;  %2712 = vmatprep.mubr.msk.f32.mxu1 %vm2006_vm13, %v2681_v59  ;;  %v2684_v14 = vsel %vm2089_vm7, 1.0, %v3041_v30 }
 0x333   : > { %2700 = vmatmul.mubr.msk.f32.gmra.mrb[8].mxu0 %vm308_vm8, %v3042_v12  ;;  %2418 = vmatmul.mubr.f32.gmra.mrb[8].mxu1 %v3041_v30  ;;  %vm2091_vm8 = vcmp.eq.s32.totalorder %v2052_v0, %v3824_v46 }
 0x334   : > { %2362 = vmatprep.mubr.f32.mxu0 %v3041_v30  ;;  %2713 = vmatprep.mubr.msk.f32.mxu1 %vm2006_vm13, %v2682_v57  ;;  %v2685_v32 = vsel %vm2091_vm8, 1.0, %v3041_v30 }
 0x337   : > { %2701 = vmatmul.mubr.msk.f32.gmra.mrb[10].mxu0 %vm309_vm9, %v3042_v12  ;;  %2423 = vmatmul.mubr.f32.gmra.mrb[10].mxu1 %v3041_v30  ;;  %vm2064_vm9 = vcmp.eq.s32.totalorder %v2039_v23, %v4070_v60 }
 0x338   : > { %2367 = vmatprep.mubr.f32.mxu0 %v3041_v30  ;;  %2714 = vmatprep.mubr.msk.f32.mxu1 %vm2006_vm13, %v2683_v2 }
 0x33b   : > { %2702 = vmatmul.mubr.msk.f32.gmra.mrb[12].mxu0 %vm310_vm5, %v3042_v12  ;;  %2428 = vmatmul.mubr.f32.gmra.mrb[12].mxu1 %v3041_v30  ;;  %vm2066_vm5 = vcmp.eq.s32.totalorder %v2040_v26, %v4070_v60 }
 0x33c   : > { %2372 = vmatprep.mubr.f32.mxu0 %v3041_v30  ;;  %2715 = vmatprep.mubr.msk.f32.mxu1 %vm2006_vm13, %v2684_v14 }
 0x33f   : > { %2703 = vmatmul.mubr.msk.f32.gmra.mrb[14].mxu0 %vm2064_vm9, %v3042_v12  ;;  %2433 = vmatmul.mubr.f32.gmra.mrb[14].mxu1 %v3041_v30 }
 0x340   : > { %2377 = vmatprep.mubr.f32.mxu0 %v3041_v30  ;;  %2716 = vmatprep.mubr.msk.f32.mxu1 %vm2006_vm13, %v2685_v32 }
 0x343   : > { %2704 = vmatmul.mubr.msk.f32.gmra.mrb[16].mxu0 %vm2066_vm5, %v3042_v12  ;;  %2438 = vmatmul.mubr.f32.gmra.mrb[16].mxu1 %v3041_v30 }
 0x344   : > { %2382 = vmatprep.mubr.f32.mxu0 %v3041_v30  ;;  %2717 = vmatprep.mubr.msk.f32.mxu1 %vm2006_vm13, %v2686_v21 }
 0x347   : > { %2705 = vmatmul.mubr.msk.f32.gmra.mrb[18].mxu0 %vm2068_vm15, %v3042_v12  ;;  %2443 = vmatmul.mubr.f32.gmra.mrb[18].mxu1 %v3041_v30 }
 0x348   : > { %2387 = vmatprep.mubr.f32.mxu0 %v3041_v30  ;;  %2718 = vmatprep.mubr.msk.f32.mxu1 %vm2006_vm13, %v2687_v17 }
 0x34b   : > { %2706 = vmatmul.mubr.msk.f32.gmra.mrb[20].mxu0 %vm2070_vm1, %v3042_v12  ;;  %2448 = vmatmul.mubr.f32.gmra.mrb[20].mxu1 %v3041_v30 }
 0x34c   : > { %2392 = vmatprep.mubr.f32.mxu0 %v3041_v30  ;;  %2719 = vmatprep.mubr.msk.f32.mxu1 %vm2006_vm13, %v2688_v6 }
 0x34f   : > { %2707 = vmatmul.mubr.msk.f32.gmra.mrb[22].mxu0 %vm2072_vm3, %v3042_v12  ;;  %2453 = vmatmul.mubr.f32.gmra.mrb[22].mxu1 %v3041_v30 }
 0x3f6   : > { %v2339_v51 = vpop.f32.mrb[0].mxu0  ;;  %v2399_v53 = vpop.f32.mrb[0].mxu1 }
 0x3f7   : > { %2458 = vst.msk [vmem:[%s4024_s3] sm:$0xff] %vm504_vm2, %v2339_v51  ;;  %2470 = vst.msk [vmem:[%s4024_s3 + $0x60] sm:$0xff] %vm504_vm2, %v2399_v53  ;;  %v2341_v5 = vpop.f32.mrb[1].mxu0  ;;  %v2401_v54 = vpop.f32.mrb[1].mxu1 }
 0x3fa   : > { %v2344_v38 = vpop.f32.mrb[2].mxu0  ;;  %v2404_v61 = vpop.f32.mrb[2].mxu1 }
 0x3fb   : > { %2459 = vst.msk [vmem:[%s4024_s3 + $0x8] sm:$0xff] %vm504_vm2, %v2344_v38  ;;  %2471 = vst.msk [vmem:[%s4024_s3 + $0x68] sm:$0xff] %vm504_vm2, %v2404_v61  ;;  %v2346_v49 = vpop.f32.mrb[3].mxu0  ;;  %v2406_v31 = vpop.f32.mrb[3].mxu1 }
 0x3fe   : > { %v2349_v47 = vpop.f32.mrb[4].mxu0  ;;  %v2409_v4 = vpop.f32.mrb[4].mxu1 }
 0x3ff   : > { %2460 = vst.msk [vmem:[%s4024_s3 + $0x10] sm:$0xff] %vm504_vm2, %v2349_v47  ;;  %2472 = vst.msk [vmem:[%s4024_s3 + $0x70] sm:$0xff] %vm504_vm2, %v2409_v4  ;;  %v2351_v1 = vpop.f32.mrb[5].mxu0  ;;  %v2411_v41 = vpop.f32.mrb[5].mxu1 }
 0x402   : > { %v2354_v3 = vpop.f32.mrb[6].mxu0  ;;  %v2414_v44 = vpop.f32.mrb[6].mxu1 }
 0x403   : > { %2461 = vst.msk [vmem:[%s4024_s3 + $0x18] sm:$0xff] %vm504_vm2, %v2354_v3  ;;  %2473 = vst.msk [vmem:[%s4024_s3 + $0x78] sm:$0xff] %vm504_vm2, %v2414_v44  ;;  %v2356_v10 = vpop.f32.mrb[7].mxu0  ;;  %v2416_v30 = vpop.f32.mrb[7].mxu1 }
 0x406   : > { %v2359_v28 = vpop.f32.mrb[8].mxu0  ;;  %v2419_v18 = vpop.f32.mrb[8].mxu1 }
 0x407   : > { %2462 = vst.msk [vmem:[%s4024_s3 + $0x20] sm:$0xff] %vm504_vm2, %v2359_v28  ;;  %2474 = vst.msk [vmem:[%s4024_s3 + $0x80] sm:$0xff] %vm504_vm2, %v2419_v18  ;;  %v2361_v16 = vpop.f32.mrb[9].mxu0  ;;  %v2421_v25 = vpop.f32.mrb[9].mxu1 }
 0x40a   : > { %v2364_v35 = vpop.f32.mrb[10].mxu0  ;;  %v2424_v52 = vpop.f32.mrb[10].mxu1 }
 0x40b   : > { %2463 = vst.msk [vmem:[%s4024_s3 + $0x28] sm:$0xff] %vm504_vm2, %v2364_v35  ;;  %2475 = vst.msk [vmem:[%s4024_s3 + $0x88] sm:$0xff] %vm504_vm2, %v2424_v52  ;;  %v2366_v34 = vpop.f32.mrb[11].mxu0  ;;  %v2426_v37 = vpop.f32.mrb[11].mxu1 }
 0x40e   : > { %v2369_v15 = vpop.f32.mrb[12].mxu0  ;;  %v2429_v43 = vpop.f32.mrb[12].mxu1 }
 0x40f   : > { %2464 = vst.msk [vmem:[%s4024_s3 + $0x30] sm:$0xff] %vm504_vm2, %v2369_v15  ;;  %2476 = vst.msk [vmem:[%s4024_s3 + $0x90] sm:$0xff] %vm504_vm2, %v2429_v43  ;;  %v2371_v45 = vpop.f32.mrb[13].mxu0  ;;  %v2431_v55 = vpop.f32.mrb[13].mxu1 }
 0x412   : > { %v2374_v48 = vpop.f32.mrb[14].mxu0  ;;  %v2434_v29 = vpop.f32.mrb[14].mxu1 }
 0x413   : > { %2465 = vst.msk [vmem:[%s4024_s3 + $0x38] sm:$0xff] %vm504_vm2, %v2374_v48  ;;  %2477 = vst.msk [vmem:[%s4024_s3 + $0x98] sm:$0xff] %vm504_vm2, %v2434_v29  ;;  %v2376_v40 = vpop.f32.mrb[15].mxu0  ;;  %v2436_v60 = vpop.f32.mrb[15].mxu1 }
 0x416   : > { %v2379_v33 = vpop.f32.mrb[16].mxu0  ;;  %v2439_v12 = vpop.f32.mrb[16].mxu1 }
 0x417   : > { %2466 = vst.msk [vmem:[%s4024_s3 + $0x40] sm:$0xff] %vm504_vm2, %v2379_v33  ;;  %2478 = vst.msk [vmem:[%s4024_s3 + $0xa0] sm:$0xff] %vm504_vm2, %v2439_v12  ;;  %v2381_v42 = vpop.f32.mrb[17].mxu0  ;;  %v2441_v20 = vpop.f32.mrb[17].mxu1 }
 0x41a   : > { %v2384_v46 = vpop.f32.mrb[18].mxu0  ;;  %v2444_v56 = vpop.f32.mrb[18].mxu1 }
 0x41b   : > { %2467 = vst.msk [vmem:[%s4024_s3 + $0x48] sm:$0xff] %vm504_vm2, %v2384_v46  ;;  %2479 = vst.msk [vmem:[%s4024_s3 + $0xa8] sm:$0xff] %vm504_vm2, %v2444_v56  ;;  %v2386_v58 = vpop.f32.mrb[19].mxu0  ;;  %v2446_v13 = vpop.f32.mrb[19].mxu1 }
 0x41e   : > { %v2389_v11 = vpop.f32.mrb[20].mxu0  ;;  %v2449_v59 = vpop.f32.mrb[20].mxu1 }
 0x41f   : > { %2468 = vst.msk [vmem:[%s4024_s3 + $0x50] sm:$0xff] %vm504_vm2, %v2389_v11  ;;  %2480 = vst.msk [vmem:[%s4024_s3 + $0xb0] sm:$0xff] %vm504_vm2, %v2449_v59  ;;  %v2391_v39 = vpop.f32.mrb[21].mxu0  ;;  %v2451_v36 = vpop.f32.mrb[21].mxu1 }
 0x422   : > { %v2394_v57 = vpop.f32.mrb[22].mxu0  ;;  %v2454_v62 = vpop.f32.mrb[22].mxu1 }
 0x423   : > { %2469 = vst.msk [vmem:[%s4024_s3 + $0x58] sm:$0xff] %vm504_vm2, %v2394_v57  ;;  %2481 = vst.msk [vmem:[%s4024_s3 + $0xb8] sm:$0xff] %vm504_vm2, %v2454_v62  ;;  %v2396_v7 = vpop.f32.mrb[23].mxu0  ;;  %v2456_v2 = vpop.f32.mrb[23].mxu1 }
 0x424 PF: > { %s13_s12 = sadd.s32 1, %s3035_s12  }
 0x425   : > { %p10_p7 = scmp.ge.s32.totalorder %s13_s12, 5  }
 0x427   :  { %12 = sbr.rel (!%p10_p7) target bundleno = 1 (0x1), region = 72 }

</bundles_post_ra>
